<compile_context>
chip_gen: v6e
topology: v6e:2x2x1
jax: 0.10.0
libtpu: 0.0.40
codegen_flags: <defaults>
</compile_context>

<pallas_src>
import jax
import jax.numpy as jnp
import numpy as np
from jax.experimental import pallas as pl
from jax.experimental.pallas import tpu as pltpu


def _make_decoder_kernel(seq_len, batch_pad, hidden, num_layers):
    T, B, H, L = seq_len, batch_pad, hidden, num_layers
    G = 4 * H

    def lstm_cell(gates, c_prev):
        # Full-tile EUP passes, then static lane slices.
        # PyTorch gate order: [i, f, g, o].
        sg = jax.nn.sigmoid(gates)
        tg = jnp.tanh(gates)
        i_g = sg[:, 0 * H:1 * H]
        f_g = sg[:, 1 * H:2 * H]
        g_g = tg[:, 2 * H:3 * H]
        o_g = sg[:, 3 * H:4 * H]
        c_new = f_g * c_prev + i_g * g_g
        h_new = o_g * jnp.tanh(c_new)
        return h_new, c_new

    def kernel(x2d_ref, h0_ref, c0_ref, w_ih0_ref, wblk_ref, bias_ref,
               y_ref, hn_ref, cn_ref):
        # ---- Hoisted layer-0 input projection (off the serial path) --------
        xp0 = jnp.dot(x2d_ref[...], w_ih0_ref[...],
                      preferred_element_type=jnp.float32)        # (T*B, 4H)

        wblk = wblk_ref[...]      # (L*H, L*4H) block-packed recurrent weights
        bias = bias_ref[...]      # (1, L*4H)   concatenated per-layer biases

        # Recurrent state held as traced values (vregs), not VMEM scratch.
        h = [h0_ref[l] for l in range(L)]
        c = [c0_ref[l] for l in range(L)]
        ys = []

        # ---- Wavefront over (time, layer): wave s -> layer l at t = s - l --
        # All per-wave gate matmuls fused into ONE MXU call.
        for s in range(T + L - 1):
            hcat = jnp.concatenate(h, axis=1)                    # (B, L*H)
            gates_all = jnp.dot(hcat, wblk,
                                preferred_element_type=jnp.float32) + bias
            new_h, new_c = list(h), list(c)
            for l in range(L):
                t = s - l
                if 0 <= t < T:          # static (Python) activity mask
                    g = gates_all[:, l * G:(l + 1) * G]
                    if l == 0:
                        # 8-sublane-aligned slice of the hoisted projection.
                        g = g + xp0[t * B:(t + 1) * B, :]
                    h_l, c_l = lstm_cell(g, c[l])
                    new_h[l], new_c[l] = h_l, c_l
                    if l == L - 1:
                        ys.append(h_l)
            h, c = new_h, new_c

        # ---- Single lane-dense flush of outputs and final states -----------
        y_ref[...] = jnp.concatenate(ys, axis=1)                 # (B, T*H)
        for l in range(L):
            hn_ref[l] = h[l]
            cn_ref[l] = c[l]

    return kernel


def decoder_forward(input_tensor, short_term, long_term, params):
    """Equivalent of Decoder.forward.

    input_tensor: (T, B, input_size)
    short_term  : (L, B, H)   (h_0)
    long_term   : (L, B, H)   (c_0)
    params      : list of (w_ih (F_in,4H), w_hh (H,4H), bias (1,4H)) per layer
    returns (output, (h_n, c_n)) with output (T, B, H), h_n/c_n (L, B, H).
    """
    T, B, F = input_tensor.shape
    L = len(params)
    H = short_term.shape[-1]
    G = 4 * H

    # Pad batch to a whole 8-sublane group; padded rows are free compute and
    # are sliced away after the call.
    B_pad = max(8, ((B + 7) // 8) * 8)
    pad = B_pad - B
    x_p = jnp.pad(input_tensor, ((0, 0), (0, pad), (0, 0)))
    h0_p = jnp.pad(short_term, ((0, 0), (0, pad), (0, 0)))
    c0_p = jnp.pad(long_term, ((0, 0), (0, pad), (0, 0)))
    x2d = x_p.reshape(T * B_pad, F)       # free row-major merge of (T, B)

    # ---- Trace-time weight packing -----------------------------------------
    # Column block l of the block matrix collects every matmul feeding layer
    # l's gates in a wave:
    #   rows [l*H,(l+1)*H)     -> w_hh_l  (own recurrence, h_l at t-1)
    #   rows [(l-1)*H, l*H)    -> w_ih_l  (output of layer l-1 at t), l >= 1
    # Layer 0's input projection stays hoisted (w_ih0 passed separately).
    w_ih0 = params[0][0]
    wblk = jnp.zeros((L * H, L * G), jnp.float32)
    for l, (w_ih, w_hh, _) in enumerate(params):
        wblk = wblk.at[l * H:(l + 1) * H, l * G:(l + 1) * G].set(w_hh)
        if l >= 1:
            wblk = wblk.at[(l - 1) * H:l * H, l * G:(l + 1) * G].set(w_ih)
    bias_cat = jnp.concatenate([b for (_, _, b) in params], axis=1)  # (1, L*4H)

    kernel = _make_decoder_kernel(T, B_pad, H, L)
    vmem = pl.BlockSpec(memory_space=pltpu.MemorySpace.VMEM)

    y_slab, hn, cn = pl.pallas_call(
        kernel,
        out_shape=(
            jax.ShapeDtypeStruct((B_pad, T * H), jnp.float32),   # lane-dense y
            jax.ShapeDtypeStruct((L, B_pad, H), jnp.float32),    # h_n
            jax.ShapeDtypeStruct((L, B_pad, H), jnp.float32),    # c_n
        ),
        in_specs=[vmem] * 6,
        out_specs=(vmem, vmem, vmem),
    )(x2d, h0_p, c0_p, w_ih0, wblk, bias_cat)

    # (B_pad, T*H) slab -> (T, B, H); drop batch padding.
    y = y_slab.reshape(B_pad, T, H).transpose(1, 0, 2)[:, :B, :]
    return y, (hn[:, :B, :], cn[:, :B, :])


def init_decoder_params(key, input_size, hidden_size, layer_num):
    """Deterministic PyTorch-style uniform(-1/sqrt(H), 1/sqrt(H)) init.

    Weights are stored transposed: w_ih (F_in, 4H), w_hh (H, 4H), bias (1, 4H),
    where bias = b_ih + b_hh (they always appear summed in the gate equations).
    """
    bound = 1.0 / np.sqrt(hidden_size)
    params = []
    for l in range(layer_num):
        f_in = input_size if l == 0 else hidden_size
        key, k1, k2, k3, k4 = jax.random.split(key, 5)
        w_ih = jax.random.uniform(k1, (f_in, 4 * hidden_size),
                                  jnp.float32, -bound, bound)
        w_hh = jax.random.uniform(k2, (hidden_size, 4 * hidden_size),
                                  jnp.float32, -bound, bound)
        b_ih = jax.random.uniform(k3, (1, 4 * hidden_size),
                                  jnp.float32, -bound, bound)
        b_hh = jax.random.uniform(k4, (1, 4 * hidden_size),
                                  jnp.float32, -bound, bound)
        params.append((w_ih, w_hh, b_ih + b_hh))
    return params


def _reference_forward(input_tensor, short_term, long_term, params):
    """Pure-JAX reference of the same LSTM math (for sanity checking)."""
    T, B, _ = input_tensor.shape
    H = short_term.shape[-1]
    layer_in = input_tensor
    hns, cns = [], []
    for l, (w_ih, w_hh, b) in enumerate(params):
        h, c = short_term[l], long_term[l]
        ys = []
        for t in range(T):
            gates = layer_in[t] @ w_ih + h @ w_hh + b
            i = jax.nn.sigmoid(gates[:, 0 * H:1 * H])
            f = jax.nn.sigmoid(gates[:, 1 * H:2 * H])
            g = jnp.tanh(gates[:, 2 * H:3 * H])
            o = jax.nn.sigmoid(gates[:, 3 * H:4 * H])
            c = f * c + i * g
            h = o * jnp.tanh(c)
            ys.append(h)
        layer_in = jnp.stack(ys, axis=0)
        hns.append(h)
        cns.append(c)
    return layer_in, (jnp.stack(hns, 0), jnp.stack(cns, 0))


if __name__ == "__main__":
    # Small shapes consistent with the module: seq=8, batch=2, input=8,
    # hidden=32, layers=2.
    T, B, INPUT, HIDDEN, LAYERS = 8, 2, 8, 32, 2

    key = jax.random.PRNGKey(0)
    k_p, k_x, k_h, k_c = jax.random.split(key, 4)

    params = init_decoder_params(k_p, INPUT, HIDDEN, LAYERS)
    x = jax.random.normal(k_x, (T, B, INPUT), jnp.float32)
    h0 = jax.random.normal(k_h, (LAYERS, B, HIDDEN), jnp.float32)
    c0 = jax.random.normal(k_c, (LAYERS, B, HIDDEN), jnp.float32)

    out, (hn, cn) = decoder_forward(x, h0, c0, params)
    jax.block_until_ready((out, hn, cn))

    # Sanity check against a pure-JAX reference (loose tolerance for MXU f32 path).
    ref_out, (ref_hn, ref_cn) = _reference_forward(x, h0, c0, params)
    np.testing.assert_allclose(np.asarray(out), np.asarray(ref_out), atol=1e-2, rtol=1e-2)
    np.testing.assert_allclose(np.asarray(hn), np.asarray(ref_hn), atol=1e-2, rtol=1e-2)
    np.testing.assert_allclose(np.asarray(cn), np.asarray(ref_cn), atol=1e-2, rtol=1e-2)

    assert out.shape == (T, B, HIDDEN)
    assert hn.shape == (LAYERS, B, HIDDEN) and cn.shape == (LAYERS, B, HIDDEN)
    print("KERNEL_OK")
</pallas_src>

<mosaic_0001>
module attributes {stable_mosaic.version = 11 : i64} {
  func.func @kernel(%arg0: memref<64x8xf32, #tpu.memory_space<vmem>>, %arg1: memref<2x8x32xf32, #tpu.memory_space<vmem>>, %arg2: memref<2x8x32xf32, #tpu.memory_space<vmem>>, %arg3: memref<8x128xf32, #tpu.memory_space<vmem>>, %arg4: memref<64x256xf32, #tpu.memory_space<vmem>>, %arg5: memref<1x256xf32, #tpu.memory_space<vmem>>, %arg6: memref<8x256xf32, #tpu.memory_space<vmem>>, %arg7: memref<2x8x32xf32, #tpu.memory_space<vmem>>, %arg8: memref<2x8x32xf32, #tpu.memory_space<vmem>>) attributes {dimension_semantics = [], scalar_prefetch = 0 : i64, scratch_operands = 0 : i64, tpu.core_type = #tpu.core_type<tc>} {
    %c0 = arith.constant 0 : index
    %c0_0 = arith.constant 0 : index
    %0 = vector.load %arg0[%c0, %c0_0] : memref<64x8xf32, #tpu.memory_space<vmem>>, vector<64x8xf32>
    %c0_1 = arith.constant 0 : index
    %c0_2 = arith.constant 0 : index
    %1 = vector.load %arg3[%c0_1, %c0_2] : memref<8x128xf32, #tpu.memory_space<vmem>>, vector<8x128xf32>
    %cst = arith.constant dense<0.000000e+00> : vector<64x128xf32>
    %2 = tpu.matmul %0, %1, %cst {dimension_numbers = #tpu.dot_dimension_numbers<[1], [0], [0], [1], [0, 0, 1, 1], [], []>} : vector<64x8xf32>, vector<8x128xf32>, vector<64x128xf32> -> vector<64x128xf32>
    %c0_3 = arith.constant 0 : index
    %c0_4 = arith.constant 0 : index
    %3 = vector.load %arg4[%c0_3, %c0_4] : memref<64x256xf32, #tpu.memory_space<vmem>>, vector<64x256xf32>
    %c0_5 = arith.constant 0 : index
    %c0_6 = arith.constant 0 : index
    %4 = vector.load %arg5[%c0_5, %c0_6] : memref<1x256xf32, #tpu.memory_space<vmem>>, vector<1x256xf32>
    %c0_7 = arith.constant 0 : index
    %c0_8 = arith.constant 0 : index
    %c0_9 = arith.constant 0 : index
    %5 = vector.load %arg1[%c0_7, %c0_8, %c0_9] : memref<2x8x32xf32, #tpu.memory_space<vmem>>, vector<1x8x32xf32>
    %6 = vector.shape_cast %5 : vector<1x8x32xf32> to vector<8x32xf32>
    %c1 = arith.constant 1 : index
    %c0_10 = arith.constant 0 : index
    %c0_11 = arith.constant 0 : index
    %7 = vector.load %arg1[%c1, %c0_10, %c0_11] : memref<2x8x32xf32, #tpu.memory_space<vmem>>, vector<1x8x32xf32>
    %8 = vector.shape_cast %7 : vector<1x8x32xf32> to vector<8x32xf32>
    %c0_12 = arith.constant 0 : index
    %c0_13 = arith.constant 0 : index
    %c0_14 = arith.constant 0 : index
    %9 = vector.load %arg2[%c0_12, %c0_13, %c0_14] : memref<2x8x32xf32, #tpu.memory_space<vmem>>, vector<1x8x32xf32>
    %10 = vector.shape_cast %9 : vector<1x8x32xf32> to vector<8x32xf32>
    %c1_15 = arith.constant 1 : index
    %c0_16 = arith.constant 0 : index
    %c0_17 = arith.constant 0 : index
    %11 = vector.load %arg2[%c1_15, %c0_16, %c0_17] : memref<2x8x32xf32, #tpu.memory_space<vmem>>, vector<1x8x32xf32>
    %12 = vector.shape_cast %11 : vector<1x8x32xf32> to vector<8x32xf32>
    %13 = tpu.concatenate %6, %8 in 1 : vector<8x32xf32>, vector<8x32xf32> -> vector<8x64xf32>
    %cst_18 = arith.constant dense<0.000000e+00> : vector<8x256xf32>
    %14 = tpu.matmul %13, %3, %cst_18 {dimension_numbers = #tpu.dot_dimension_numbers<[1], [0], [0], [1], [0, 0, 1, 1], [], []>} : vector<8x64xf32>, vector<64x256xf32>, vector<8x256xf32> -> vector<8x256xf32>
    %15 = vector.broadcast %4 : vector<1x256xf32> to vector<8x256xf32>
    %16 = arith.addf %14, %15 : vector<8x256xf32>
    %17 = vector.extract_strided_slice %16 {offsets = [0, 0], sizes = [8, 128], strides = [1, 1]} : vector<8x256xf32> to vector<8x128xf32>
    %18 = vector.extract_strided_slice %2 {offsets = [0, 0], sizes = [8, 128], strides = [1, 1]} : vector<64x128xf32> to vector<8x128xf32>
    %19 = arith.addf %17, %18 : vector<8x128xf32>
    %20 = arith.negf %19 : vector<8x128xf32>
    %21 = math.exp %20 : vector<8x128xf32>
    %cst_19 = arith.constant 1.000000e+00 : f32
    %22 = vector.broadcast %cst_19 : f32 to vector<8x128xf32>
    %23 = arith.addf %22, %21 : vector<8x128xf32>
    %24 = arith.divf %22, %23 : vector<8x128xf32>
    %25 = math.tanh %19 : vector<8x128xf32>
    %26 = vector.extract_strided_slice %24 {offsets = [0, 0], sizes = [8, 32], strides = [1, 1]} : vector<8x128xf32> to vector<8x32xf32>
    %27 = vector.extract_strided_slice %24 {offsets = [0, 32], sizes = [8, 32], strides = [1, 1]} : vector<8x128xf32> to vector<8x32xf32>
    %28 = vector.extract_strided_slice %25 {offsets = [0, 64], sizes = [8, 32], strides = [1, 1]} : vector<8x128xf32> to vector<8x32xf32>
    %29 = vector.extract_strided_slice %24 {offsets = [0, 96], sizes = [8, 32], strides = [1, 1]} : vector<8x128xf32> to vector<8x32xf32>
    %30 = arith.mulf %27, %10 : vector<8x32xf32>
    %31 = arith.mulf %26, %28 : vector<8x32xf32>
    %32 = arith.addf %30, %31 : vector<8x32xf32>
    %33 = math.tanh %32 : vector<8x32xf32>
    %34 = arith.mulf %29, %33 : vector<8x32xf32>
    %35 = tpu.concatenate %34, %8 in 1 : vector<8x32xf32>, vector<8x32xf32> -> vector<8x64xf32>
    %cst_20 = arith.constant dense<0.000000e+00> : vector<8x256xf32>
    %36 = tpu.matmul %35, %3, %cst_20 {dimension_numbers = #tpu.dot_dimension_numbers<[1], [0], [0], [1], [0, 0, 1, 1], [], []>} : vector<8x64xf32>, vector<64x256xf32>, vector<8x256xf32> -> vector<8x256xf32>
    %37 = vector.broadcast %4 : vector<1x256xf32> to vector<8x256xf32>
    %38 = arith.addf %36, %37 : vector<8x256xf32>
    %39 = vector.extract_strided_slice %38 {offsets = [0, 0], sizes = [8, 128], strides = [1, 1]} : vector<8x256xf32> to vector<8x128xf32>
    %40 = vector.extract_strided_slice %2 {offsets = [8, 0], sizes = [8, 128], strides = [1, 1]} : vector<64x128xf32> to vector<8x128xf32>
    %41 = arith.addf %39, %40 : vector<8x128xf32>
    %42 = arith.negf %41 : vector<8x128xf32>
    %43 = math.exp %42 : vector<8x128xf32>
    %cst_21 = arith.constant 1.000000e+00 : f32
    %44 = vector.broadcast %cst_21 : f32 to vector<8x128xf32>
    %45 = arith.addf %44, %43 : vector<8x128xf32>
    %46 = arith.divf %44, %45 : vector<8x128xf32>
    %47 = math.tanh %41 : vector<8x128xf32>
    %48 = vector.extract_strided_slice %46 {offsets = [0, 0], sizes = [8, 32], strides = [1, 1]} : vector<8x128xf32> to vector<8x32xf32>
    %49 = vector.extract_strided_slice %46 {offsets = [0, 32], sizes = [8, 32], strides = [1, 1]} : vector<8x128xf32> to vector<8x32xf32>
    %50 = vector.extract_strided_slice %47 {offsets = [0, 64], sizes = [8, 32], strides = [1, 1]} : vector<8x128xf32> to vector<8x32xf32>
    %51 = vector.extract_strided_slice %46 {offsets = [0, 96], sizes = [8, 32], strides = [1, 1]} : vector<8x128xf32> to vector<8x32xf32>
    %52 = arith.mulf %49, %32 : vector<8x32xf32>
    %53 = arith.mulf %48, %50 : vector<8x32xf32>
    %54 = arith.addf %52, %53 : vector<8x32xf32>
    %55 = math.tanh %54 : vector<8x32xf32>
    %56 = arith.mulf %51, %55 : vector<8x32xf32>
    %57 = vector.extract_strided_slice %38 {offsets = [0, 128], sizes = [8, 128], strides = [1, 1]} : vector<8x256xf32> to vector<8x128xf32>
    %58 = arith.negf %57 : vector<8x128xf32>
    %59 = math.exp %58 : vector<8x128xf32>
    %cst_22 = arith.constant 1.000000e+00 : f32
    %60 = vector.broadcast %cst_22 : f32 to vector<8x128xf32>
    %61 = arith.addf %60, %59 : vector<8x128xf32>
    %62 = arith.divf %60, %61 : vector<8x128xf32>
    %63 = math.tanh %57 : vector<8x128xf32>
    %64 = vector.extract_strided_slice %62 {offsets = [0, 0], sizes = [8, 32], strides = [1, 1]} : vector<8x128xf32> to vector<8x32xf32>
    %65 = vector.extract_strided_slice %62 {offsets = [0, 32], sizes = [8, 32], strides = [1, 1]} : vector<8x128xf32> to vector<8x32xf32>
    %66 = vector.extract_strided_slice %63 {offsets = [0, 64], sizes = [8, 32], strides = [1, 1]} : vector<8x128xf32> to vector<8x32xf32>
    %67 = vector.extract_strided_slice %62 {offsets = [0, 96], sizes = [8, 32], strides = [1, 1]} : vector<8x128xf32> to vector<8x32xf32>
    %68 = arith.mulf %65, %12 : vector<8x32xf32>
    %69 = arith.mulf %64, %66 : vector<8x32xf32>
    %70 = arith.addf %68, %69 : vector<8x32xf32>
    %71 = math.tanh %70 : vector<8x32xf32>
    %72 = arith.mulf %67, %71 : vector<8x32xf32>
    %73 = tpu.concatenate %56, %72 in 1 : vector<8x32xf32>, vector<8x32xf32> -> vector<8x64xf32>
    %cst_23 = arith.constant dense<0.000000e+00> : vector<8x256xf32>
    %74 = tpu.matmul %73, %3, %cst_23 {dimension_numbers = #tpu.dot_dimension_numbers<[1], [0], [0], [1], [0, 0, 1, 1], [], []>} : vector<8x64xf32>, vector<64x256xf32>, vector<8x256xf32> -> vector<8x256xf32>
    %75 = vector.broadcast %4 : vector<1x256xf32> to vector<8x256xf32>
    %76 = arith.addf %74, %75 : vector<8x256xf32>
    %77 = vector.extract_strided_slice %76 {offsets = [0, 0], sizes = [8, 128], strides = [1, 1]} : vector<8x256xf32> to vector<8x128xf32>
    %78 = vector.extract_strided_slice %2 {offsets = [16, 0], sizes = [8, 128], strides = [1, 1]} : vector<64x128xf32> to vector<8x128xf32>
    %79 = arith.addf %77, %78 : vector<8x128xf32>
    %80 = arith.negf %79 : vector<8x128xf32>
    %81 = math.exp %80 : vector<8x128xf32>
    %cst_24 = arith.constant 1.000000e+00 : f32
    %82 = vector.broadcast %cst_24 : f32 to vector<8x128xf32>
    %83 = arith.addf %82, %81 : vector<8x128xf32>
    %84 = arith.divf %82, %83 : vector<8x128xf32>
    %85 = math.tanh %79 : vector<8x128xf32>
    %86 = vector.extract_strided_slice %84 {offsets = [0, 0], sizes = [8, 32], strides = [1, 1]} : vector<8x128xf32> to vector<8x32xf32>
    %87 = vector.extract_strided_slice %84 {offsets = [0, 32], sizes = [8, 32], strides = [1, 1]} : vector<8x128xf32> to vector<8x32xf32>
    %88 = vector.extract_strided_slice %85 {offsets = [0, 64], sizes = [8, 32], strides = [1, 1]} : vector<8x128xf32> to vector<8x32xf32>
    %89 = vector.extract_strided_slice %84 {offsets = [0, 96], sizes = [8, 32], strides = [1, 1]} : vector<8x128xf32> to vector<8x32xf32>
    %90 = arith.mulf %87, %54 : vector<8x32xf32>
    %91 = arith.mulf %86, %88 : vector<8x32xf32>
    %92 = arith.addf %90, %91 : vector<8x32xf32>
    %93 = math.tanh %92 : vector<8x32xf32>
    %94 = arith.mulf %89, %93 : vector<8x32xf32>
    %95 = vector.extract_strided_slice %76 {offsets = [0, 128], sizes = [8, 128], strides = [1, 1]} : vector<8x256xf32> to vector<8x128xf32>
    %96 = arith.negf %95 : vector<8x128xf32>
    %97 = math.exp %96 : vector<8x128xf32>
    %cst_25 = arith.constant 1.000000e+00 : f32
    %98 = vector.broadcast %cst_25 : f32 to vector<8x128xf32>
    %99 = arith.addf %98, %97 : vector<8x128xf32>
    %100 = arith.divf %98, %99 : vector<8x128xf32>
    %101 = math.tanh %95 : vector<8x128xf32>
    %102 = vector.extract_strided_slice %100 {offsets = [0, 0], sizes = [8, 32], strides = [1, 1]} : vector<8x128xf32> to vector<8x32xf32>
    %103 = vector.extract_strided_slice %100 {offsets = [0, 32], sizes = [8, 32], strides = [1, 1]} : vector<8x128xf32> to vector<8x32xf32>
    %104 = vector.extract_strided_slice %101 {offsets = [0, 64], sizes = [8, 32], strides = [1, 1]} : vector<8x128xf32> to vector<8x32xf32>
    %105 = vector.extract_strided_slice %100 {offsets = [0, 96], sizes = [8, 32], strides = [1, 1]} : vector<8x128xf32> to vector<8x32xf32>
    %106 = arith.mulf %103, %70 : vector<8x32xf32>
    %107 = arith.mulf %102, %104 : vector<8x32xf32>
    %108 = arith.addf %106, %107 : vector<8x32xf32>
    %109 = math.tanh %108 : vector<8x32xf32>
    %110 = arith.mulf %105, %109 : vector<8x32xf32>
    %111 = tpu.concatenate %94, %110 in 1 : vector<8x32xf32>, vector<8x32xf32> -> vector<8x64xf32>
    %cst_26 = arith.constant dense<0.000000e+00> : vector<8x256xf32>
    %112 = tpu.matmul %111, %3, %cst_26 {dimension_numbers = #tpu.dot_dimension_numbers<[1], [0], [0], [1], [0, 0, 1, 1], [], []>} : vector<8x64xf32>, vector<64x256xf32>, vector<8x256xf32> -> vector<8x256xf32>
    %113 = vector.broadcast %4 : vector<1x256xf32> to vector<8x256xf32>
    %114 = arith.addf %112, %113 : vector<8x256xf32>
    %115 = vector.extract_strided_slice %114 {offsets = [0, 0], sizes = [8, 128], strides = [1, 1]} : vector<8x256xf32> to vector<8x128xf32>
    %116 = vector.extract_strided_slice %2 {offsets = [24, 0], sizes = [8, 128], strides = [1, 1]} : vector<64x128xf32> to vector<8x128xf32>
    %117 = arith.addf %115, %116 : vector<8x128xf32>
    %118 = arith.negf %117 : vector<8x128xf32>
    %119 = math.exp %118 : vector<8x128xf32>
    %cst_27 = arith.constant 1.000000e+00 : f32
    %120 = vector.broadcast %cst_27 : f32 to vector<8x128xf32>
    %121 = arith.addf %120, %119 : vector<8x128xf32>
    %122 = arith.divf %120, %121 : vector<8x128xf32>
    %123 = math.tanh %117 : vector<8x128xf32>
    %124 = vector.extract_strided_slice %122 {offsets = [0, 0], sizes = [8, 32], strides = [1, 1]} : vector<8x128xf32> to vector<8x32xf32>
    %125 = vector.extract_strided_slice %122 {offsets = [0, 32], sizes = [8, 32], strides = [1, 1]} : vector<8x128xf32> to vector<8x32xf32>
    %126 = vector.extract_strided_slice %123 {offsets = [0, 64], sizes = [8, 32], strides = [1, 1]} : vector<8x128xf32> to vector<8x32xf32>
    %127 = vector.extract_strided_slice %122 {offsets = [0, 96], sizes = [8, 32], strides = [1, 1]} : vector<8x128xf32> to vector<8x32xf32>
    %128 = arith.mulf %125, %92 : vector<8x32xf32>
    %129 = arith.mulf %124, %126 : vector<8x32xf32>
    %130 = arith.addf %128, %129 : vector<8x32xf32>
    %131 = math.tanh %130 : vector<8x32xf32>
    %132 = arith.mulf %127, %131 : vector<8x32xf32>
    %133 = vector.extract_strided_slice %114 {offsets = [0, 128], sizes = [8, 128], strides = [1, 1]} : vector<8x256xf32> to vector<8x128xf32>
    %134 = arith.negf %133 : vector<8x128xf32>
    %135 = math.exp %134 : vector<8x128xf32>
    %cst_28 = arith.constant 1.000000e+00 : f32
    %136 = vector.broadcast %cst_28 : f32 to vector<8x128xf32>
    %137 = arith.addf %136, %135 : vector<8x128xf32>
    %138 = arith.divf %136, %137 : vector<8x128xf32>
    %139 = math.tanh %133 : vector<8x128xf32>
    %140 = vector.extract_strided_slice %138 {offsets = [0, 0], sizes = [8, 32], strides = [1, 1]} : vector<8x128xf32> to vector<8x32xf32>
    %141 = vector.extract_strided_slice %138 {offsets = [0, 32], sizes = [8, 32], strides = [1, 1]} : vector<8x128xf32> to vector<8x32xf32>
    %142 = vector.extract_strided_slice %139 {offsets = [0, 64], sizes = [8, 32], strides = [1, 1]} : vector<8x128xf32> to vector<8x32xf32>
    %143 = vector.extract_strided_slice %138 {offsets = [0, 96], sizes = [8, 32], strides = [1, 1]} : vector<8x128xf32> to vector<8x32xf32>
    %144 = arith.mulf %141, %108 : vector<8x32xf32>
    %145 = arith.mulf %140, %142 : vector<8x32xf32>
    %146 = arith.addf %144, %145 : vector<8x32xf32>
    %147 = math.tanh %146 : vector<8x32xf32>
    %148 = arith.mulf %143, %147 : vector<8x32xf32>
    %149 = tpu.concatenate %132, %148 in 1 : vector<8x32xf32>, vector<8x32xf32> -> vector<8x64xf32>
    %cst_29 = arith.constant dense<0.000000e+00> : vector<8x256xf32>
    %150 = tpu.matmul %149, %3, %cst_29 {dimension_numbers = #tpu.dot_dimension_numbers<[1], [0], [0], [1], [0, 0, 1, 1], [], []>} : vector<8x64xf32>, vector<64x256xf32>, vector<8x256xf32> -> vector<8x256xf32>
    %151 = vector.broadcast %4 : vector<1x256xf32> to vector<8x256xf32>
    %152 = arith.addf %150, %151 : vector<8x256xf32>
    %153 = vector.extract_strided_slice %152 {offsets = [0, 0], sizes = [8, 128], strides = [1, 1]} : vector<8x256xf32> to vector<8x128xf32>
    %154 = vector.extract_strided_slice %2 {offsets = [32, 0], sizes = [8, 128], strides = [1, 1]} : vector<64x128xf32> to vector<8x128xf32>
    %155 = arith.addf %153, %154 : vector<8x128xf32>
    %156 = arith.negf %155 : vector<8x128xf32>
    %157 = math.exp %156 : vector<8x128xf32>
    %cst_30 = arith.constant 1.000000e+00 : f32
    %158 = vector.broadcast %cst_30 : f32 to vector<8x128xf32>
    %159 = arith.addf %158, %157 : vector<8x128xf32>
    %160 = arith.divf %158, %159 : vector<8x128xf32>
    %161 = math.tanh %155 : vector<8x128xf32>
    %162 = vector.extract_strided_slice %160 {offsets = [0, 0], sizes = [8, 32], strides = [1, 1]} : vector<8x128xf32> to vector<8x32xf32>
    %163 = vector.extract_strided_slice %160 {offsets = [0, 32], sizes = [8, 32], strides = [1, 1]} : vector<8x128xf32> to vector<8x32xf32>
    %164 = vector.extract_strided_slice %161 {offsets = [0, 64], sizes = [8, 32], strides = [1, 1]} : vector<8x128xf32> to vector<8x32xf32>
    %165 = vector.extract_strided_slice %160 {offsets = [0, 96], sizes = [8, 32], strides = [1, 1]} : vector<8x128xf32> to vector<8x32xf32>
    %166 = arith.mulf %163, %130 : vector<8x32xf32>
    %167 = arith.mulf %162, %164 : vector<8x32xf32>
    %168 = arith.addf %166, %167 : vector<8x32xf32>
    %169 = math.tanh %168 : vector<8x32xf32>
    %170 = arith.mulf %165, %169 : vector<8x32xf32>
    %171 = vector.extract_strided_slice %152 {offsets = [0, 128], sizes = [8, 128], strides = [1, 1]} : vector<8x256xf32> to vector<8x128xf32>
    %172 = arith.negf %171 : vector<8x128xf32>
    %173 = math.exp %172 : vector<8x128xf32>
    %cst_31 = arith.constant 1.000000e+00 : f32
    %174 = vector.broadcast %cst_31 : f32 to vector<8x128xf32>
    %175 = arith.addf %174, %173 : vector<8x128xf32>
    %176 = arith.divf %174, %175 : vector<8x128xf32>
    %177 = math.tanh %171 : vector<8x128xf32>
    %178 = vector.extract_strided_slice %176 {offsets = [0, 0], sizes = [8, 32], strides = [1, 1]} : vector<8x128xf32> to vector<8x32xf32>
    %179 = vector.extract_strided_slice %176 {offsets = [0, 32], sizes = [8, 32], strides = [1, 1]} : vector<8x128xf32> to vector<8x32xf32>
    %180 = vector.extract_strided_slice %177 {offsets = [0, 64], sizes = [8, 32], strides = [1, 1]} : vector<8x128xf32> to vector<8x32xf32>
    %181 = vector.extract_strided_slice %176 {offsets = [0, 96], sizes = [8, 32], strides = [1, 1]} : vector<8x128xf32> to vector<8x32xf32>
    %182 = arith.mulf %179, %146 : vector<8x32xf32>
    %183 = arith.mulf %178, %180 : vector<8x32xf32>
    %184 = arith.addf %182, %183 : vector<8x32xf32>
    %185 = math.tanh %184 : vector<8x32xf32>
    %186 = arith.mulf %181, %185 : vector<8x32xf32>
    %187 = tpu.concatenate %170, %186 in 1 : vector<8x32xf32>, vector<8x32xf32> -> vector<8x64xf32>
    %cst_32 = arith.constant dense<0.000000e+00> : vector<8x256xf32>
    %188 = tpu.matmul %187, %3, %cst_32 {dimension_numbers = #tpu.dot_dimension_numbers<[1], [0], [0], [1], [0, 0, 1, 1], [], []>} : vector<8x64xf32>, vector<64x256xf32>, vector<8x256xf32> -> vector<8x256xf32>
    %189 = vector.broadcast %4 : vector<1x256xf32> to vector<8x256xf32>
    %190 = arith.addf %188, %189 : vector<8x256xf32>
    %191 = vector.extract_strided_slice %190 {offsets = [0, 0], sizes = [8, 128], strides = [1, 1]} : vector<8x256xf32> to vector<8x128xf32>
    %192 = vector.extract_strided_slice %2 {offsets = [40, 0], sizes = [8, 128], strides = [1, 1]} : vector<64x128xf32> to vector<8x128xf32>
    %193 = arith.addf %191, %192 : vector<8x128xf32>
    %194 = arith.negf %193 : vector<8x128xf32>
    %195 = math.exp %194 : vector<8x128xf32>
    %cst_33 = arith.constant 1.000000e+00 : f32
    %196 = vector.broadcast %cst_33 : f32 to vector<8x128xf32>
    %197 = arith.addf %196, %195 : vector<8x128xf32>
    %198 = arith.divf %196, %197 : vector<8x128xf32>
    %199 = math.tanh %193 : vector<8x128xf32>
    %200 = vector.extract_strided_slice %198 {offsets = [0, 0], sizes = [8, 32], strides = [1, 1]} : vector<8x128xf32> to vector<8x32xf32>
    %201 = vector.extract_strided_slice %198 {offsets = [0, 32], sizes = [8, 32], strides = [1, 1]} : vector<8x128xf32> to vector<8x32xf32>
    %202 = vector.extract_strided_slice %199 {offsets = [0, 64], sizes = [8, 32], strides = [1, 1]} : vector<8x128xf32> to vector<8x32xf32>
    %203 = vector.extract_strided_slice %198 {offsets = [0, 96], sizes = [8, 32], strides = [1, 1]} : vector<8x128xf32> to vector<8x32xf32>
    %204 = arith.mulf %201, %168 : vector<8x32xf32>
    %205 = arith.mulf %200, %202 : vector<8x32xf32>
    %206 = arith.addf %204, %205 : vector<8x32xf32>
    %207 = math.tanh %206 : vector<8x32xf32>
    %208 = arith.mulf %203, %207 : vector<8x32xf32>
    %209 = vector.extract_strided_slice %190 {offsets = [0, 128], sizes = [8, 128], strides = [1, 1]} : vector<8x256xf32> to vector<8x128xf32>
    %210 = arith.negf %209 : vector<8x128xf32>
    %211 = math.exp %210 : vector<8x128xf32>
    %cst_34 = arith.constant 1.000000e+00 : f32
    %212 = vector.broadcast %cst_34 : f32 to vector<8x128xf32>
    %213 = arith.addf %212, %211 : vector<8x128xf32>
    %214 = arith.divf %212, %213 : vector<8x128xf32>
    %215 = math.tanh %209 : vector<8x128xf32>
    %216 = vector.extract_strided_slice %214 {offsets = [0, 0], sizes = [8, 32], strides = [1, 1]} : vector<8x128xf32> to vector<8x32xf32>
    %217 = vector.extract_strided_slice %214 {offsets = [0, 32], sizes = [8, 32], strides = [1, 1]} : vector<8x128xf32> to vector<8x32xf32>
    %218 = vector.extract_strided_slice %215 {offsets = [0, 64], sizes = [8, 32], strides = [1, 1]} : vector<8x128xf32> to vector<8x32xf32>
    %219 = vector.extract_strided_slice %214 {offsets = [0, 96], sizes = [8, 32], strides = [1, 1]} : vector<8x128xf32> to vector<8x32xf32>
    %220 = arith.mulf %217, %184 : vector<8x32xf32>
    %221 = arith.mulf %216, %218 : vector<8x32xf32>
    %222 = arith.addf %220, %221 : vector<8x32xf32>
    %223 = math.tanh %222 : vector<8x32xf32>
    %224 = arith.mulf %219, %223 : vector<8x32xf32>
    %225 = tpu.concatenate %208, %224 in 1 : vector<8x32xf32>, vector<8x32xf32> -> vector<8x64xf32>
    %cst_35 = arith.constant dense<0.000000e+00> : vector<8x256xf32>
    %226 = tpu.matmul %225, %3, %cst_35 {dimension_numbers = #tpu.dot_dimension_numbers<[1], [0], [0], [1], [0, 0, 1, 1], [], []>} : vector<8x64xf32>, vector<64x256xf32>, vector<8x256xf32> -> vector<8x256xf32>
    %227 = vector.broadcast %4 : vector<1x256xf32> to vector<8x256xf32>
    %228 = arith.addf %226, %227 : vector<8x256xf32>
    %229 = vector.extract_strided_slice %228 {offsets = [0, 0], sizes = [8, 128], strides = [1, 1]} : vector<8x256xf32> to vector<8x128xf32>
    %230 = vector.extract_strided_slice %2 {offsets = [48, 0], sizes = [8, 128], strides = [1, 1]} : vector<64x128xf32> to vector<8x128xf32>
    %231 = arith.addf %229, %230 : vector<8x128xf32>
    %232 = arith.negf %231 : vector<8x128xf32>
    %233 = math.exp %232 : vector<8x128xf32>
    %cst_36 = arith.constant 1.000000e+00 : f32
    %234 = vector.broadcast %cst_36 : f32 to vector<8x128xf32>
    %235 = arith.addf %234, %233 : vector<8x128xf32>
    %236 = arith.divf %234, %235 : vector<8x128xf32>
    %237 = math.tanh %231 : vector<8x128xf32>
    %238 = vector.extract_strided_slice %236 {offsets = [0, 0], sizes = [8, 32], strides = [1, 1]} : vector<8x128xf32> to vector<8x32xf32>
    %239 = vector.extract_strided_slice %236 {offsets = [0, 32], sizes = [8, 32], strides = [1, 1]} : vector<8x128xf32> to vector<8x32xf32>
    %240 = vector.extract_strided_slice %237 {offsets = [0, 64], sizes = [8, 32], strides = [1, 1]} : vector<8x128xf32> to vector<8x32xf32>
    %241 = vector.extract_strided_slice %236 {offsets = [0, 96], sizes = [8, 32], strides = [1, 1]} : vector<8x128xf32> to vector<8x32xf32>
    %242 = arith.mulf %239, %206 : vector<8x32xf32>
    %243 = arith.mulf %238, %240 : vector<8x32xf32>
    %244 = arith.addf %242, %243 : vector<8x32xf32>
    %245 = math.tanh %244 : vector<8x32xf32>
    %246 = arith.mulf %241, %245 : vector<8x32xf32>
    %247 = vector.extract_strided_slice %228 {offsets = [0, 128], sizes = [8, 128], strides = [1, 1]} : vector<8x256xf32> to vector<8x128xf32>
    %248 = arith.negf %247 : vector<8x128xf32>
    %249 = math.exp %248 : vector<8x128xf32>
    %cst_37 = arith.constant 1.000000e+00 : f32
    %250 = vector.broadcast %cst_37 : f32 to vector<8x128xf32>
    %251 = arith.addf %250, %249 : vector<8x128xf32>
    %252 = arith.divf %250, %251 : vector<8x128xf32>
    %253 = math.tanh %247 : vector<8x128xf32>
    %254 = vector.extract_strided_slice %252 {offsets = [0, 0], sizes = [8, 32], strides = [1, 1]} : vector<8x128xf32> to vector<8x32xf32>
    %255 = vector.extract_strided_slice %252 {offsets = [0, 32], sizes = [8, 32], strides = [1, 1]} : vector<8x128xf32> to vector<8x32xf32>
    %256 = vector.extract_strided_slice %253 {offsets = [0, 64], sizes = [8, 32], strides = [1, 1]} : vector<8x128xf32> to vector<8x32xf32>
    %257 = vector.extract_strided_slice %252 {offsets = [0, 96], sizes = [8, 32], strides = [1, 1]} : vector<8x128xf32> to vector<8x32xf32>
    %258 = arith.mulf %255, %222 : vector<8x32xf32>
    %259 = arith.mulf %254, %256 : vector<8x32xf32>
    %260 = arith.addf %258, %259 : vector<8x32xf32>
    %261 = math.tanh %260 : vector<8x32xf32>
    %262 = arith.mulf %257, %261 : vector<8x32xf32>
    %263 = tpu.concatenate %246, %262 in 1 : vector<8x32xf32>, vector<8x32xf32> -> vector<8x64xf32>
    %cst_38 = arith.constant dense<0.000000e+00> : vector<8x256xf32>
    %264 = tpu.matmul %263, %3, %cst_38 {dimension_numbers = #tpu.dot_dimension_numbers<[1], [0], [0], [1], [0, 0, 1, 1], [], []>} : vector<8x64xf32>, vector<64x256xf32>, vector<8x256xf32> -> vector<8x256xf32>
    %265 = vector.broadcast %4 : vector<1x256xf32> to vector<8x256xf32>
    %266 = arith.addf %264, %265 : vector<8x256xf32>
    %267 = vector.extract_strided_slice %266 {offsets = [0, 0], sizes = [8, 128], strides = [1, 1]} : vector<8x256xf32> to vector<8x128xf32>
    %268 = vector.extract_strided_slice %2 {offsets = [56, 0], sizes = [8, 128], strides = [1, 1]} : vector<64x128xf32> to vector<8x128xf32>
    %269 = arith.addf %267, %268 : vector<8x128xf32>
    %270 = arith.negf %269 : vector<8x128xf32>
    %271 = math.exp %270 : vector<8x128xf32>
    %cst_39 = arith.constant 1.000000e+00 : f32
    %272 = vector.broadcast %cst_39 : f32 to vector<8x128xf32>
    %273 = arith.addf %272, %271 : vector<8x128xf32>
    %274 = arith.divf %272, %273 : vector<8x128xf32>
    %275 = math.tanh %269 : vector<8x128xf32>
    %276 = vector.extract_strided_slice %274 {offsets = [0, 0], sizes = [8, 32], strides = [1, 1]} : vector<8x128xf32> to vector<8x32xf32>
    %277 = vector.extract_strided_slice %274 {offsets = [0, 32], sizes = [8, 32], strides = [1, 1]} : vector<8x128xf32> to vector<8x32xf32>
    %278 = vector.extract_strided_slice %275 {offsets = [0, 64], sizes = [8, 32], strides = [1, 1]} : vector<8x128xf32> to vector<8x32xf32>
    %279 = vector.extract_strided_slice %274 {offsets = [0, 96], sizes = [8, 32], strides = [1, 1]} : vector<8x128xf32> to vector<8x32xf32>
    %280 = arith.mulf %277, %244 : vector<8x32xf32>
    %281 = arith.mulf %276, %278 : vector<8x32xf32>
    %282 = arith.addf %280, %281 : vector<8x32xf32>
    %283 = math.tanh %282 : vector<8x32xf32>
    %284 = arith.mulf %279, %283 : vector<8x32xf32>
    %285 = vector.extract_strided_slice %266 {offsets = [0, 128], sizes = [8, 128], strides = [1, 1]} : vector<8x256xf32> to vector<8x128xf32>
    %286 = arith.negf %285 : vector<8x128xf32>
    %287 = math.exp %286 : vector<8x128xf32>
    %cst_40 = arith.constant 1.000000e+00 : f32
    %288 = vector.broadcast %cst_40 : f32 to vector<8x128xf32>
    %289 = arith.addf %288, %287 : vector<8x128xf32>
    %290 = arith.divf %288, %289 : vector<8x128xf32>
    %291 = math.tanh %285 : vector<8x128xf32>
    %292 = vector.extract_strided_slice %290 {offsets = [0, 0], sizes = [8, 32], strides = [1, 1]} : vector<8x128xf32> to vector<8x32xf32>
    %293 = vector.extract_strided_slice %290 {offsets = [0, 32], sizes = [8, 32], strides = [1, 1]} : vector<8x128xf32> to vector<8x32xf32>
    %294 = vector.extract_strided_slice %291 {offsets = [0, 64], sizes = [8, 32], strides = [1, 1]} : vector<8x128xf32> to vector<8x32xf32>
    %295 = vector.extract_strided_slice %290 {offsets = [0, 96], sizes = [8, 32], strides = [1, 1]} : vector<8x128xf32> to vector<8x32xf32>
    %296 = arith.mulf %293, %260 : vector<8x32xf32>
    %297 = arith.mulf %292, %294 : vector<8x32xf32>
    %298 = arith.addf %296, %297 : vector<8x32xf32>
    %299 = math.tanh %298 : vector<8x32xf32>
    %300 = arith.mulf %295, %299 : vector<8x32xf32>
    %301 = tpu.concatenate %284, %300 in 1 : vector<8x32xf32>, vector<8x32xf32> -> vector<8x64xf32>
    %cst_41 = arith.constant dense<0.000000e+00> : vector<8x256xf32>
    %302 = tpu.matmul %301, %3, %cst_41 {dimension_numbers = #tpu.dot_dimension_numbers<[1], [0], [0], [1], [0, 0, 1, 1], [], []>} : vector<8x64xf32>, vector<64x256xf32>, vector<8x256xf32> -> vector<8x256xf32>
    %303 = vector.broadcast %4 : vector<1x256xf32> to vector<8x256xf32>
    %304 = arith.addf %302, %303 : vector<8x256xf32>
    %305 = vector.extract_strided_slice %304 {offsets = [0, 128], sizes = [8, 128], strides = [1, 1]} : vector<8x256xf32> to vector<8x128xf32>
    %306 = arith.negf %305 : vector<8x128xf32>
    %307 = math.exp %306 : vector<8x128xf32>
    %cst_42 = arith.constant 1.000000e+00 : f32
    %308 = vector.broadcast %cst_42 : f32 to vector<8x128xf32>
    %309 = arith.addf %308, %307 : vector<8x128xf32>
    %310 = arith.divf %308, %309 : vector<8x128xf32>
    %311 = math.tanh %305 : vector<8x128xf32>
    %312 = vector.extract_strided_slice %310 {offsets = [0, 0], sizes = [8, 32], strides = [1, 1]} : vector<8x128xf32> to vector<8x32xf32>
    %313 = vector.extract_strided_slice %310 {offsets = [0, 32], sizes = [8, 32], strides = [1, 1]} : vector<8x128xf32> to vector<8x32xf32>
    %314 = vector.extract_strided_slice %311 {offsets = [0, 64], sizes = [8, 32], strides = [1, 1]} : vector<8x128xf32> to vector<8x32xf32>
    %315 = vector.extract_strided_slice %310 {offsets = [0, 96], sizes = [8, 32], strides = [1, 1]} : vector<8x128xf32> to vector<8x32xf32>
    %316 = arith.mulf %313, %298 : vector<8x32xf32>
    %317 = arith.mulf %312, %314 : vector<8x32xf32>
    %318 = arith.addf %316, %317 : vector<8x32xf32>
    %319 = math.tanh %318 : vector<8x32xf32>
    %320 = arith.mulf %315, %319 : vector<8x32xf32>
    %321 = tpu.concatenate %72, %110, %148, %186, %224, %262, %300, %320 in 1 : vector<8x32xf32>, vector<8x32xf32>, vector<8x32xf32>, vector<8x32xf32>, vector<8x32xf32>, vector<8x32xf32>, vector<8x32xf32>, vector<8x32xf32> -> vector<8x256xf32>
    %c0_43 = arith.constant 0 : index
    %c0_44 = arith.constant 0 : index
    %322 = vector.load %arg6[%c0_43, %c0_44] : memref<8x256xf32, #tpu.memory_space<vmem>>, vector<8x256xf32>
    tpu.vector_store %arg6[%c0_43, %c0_44], %321 {strides = array<i32>} : memref<8x256xf32, #tpu.memory_space<vmem>>, vector<8x256xf32>,
    %c0_45 = arith.constant 0 : index
    %c0_46 = arith.constant 0 : index
    %c0_47 = arith.constant 0 : index
    %323 = vector.load %arg7[%c0_45, %c0_46, %c0_47] : memref<2x8x32xf32, #tpu.memory_space<vmem>>, vector<1x8x32xf32>
    %324 = vector.shape_cast %323 : vector<1x8x32xf32> to vector<8x32xf32>
    %325 = vector.shape_cast %284 : vector<8x32xf32> to vector<1x8x32xf32>
    tpu.vector_store %arg7[%c0_45, %c0_46, %c0_47], %325 {strides = array<i32>} : memref<2x8x32xf32, #tpu.memory_space<vmem>>, vector<1x8x32xf32>,
    %c0_48 = arith.constant 0 : index
    %c0_49 = arith.constant 0 : index
    %c0_50 = arith.constant 0 : index
    %326 = vector.load %arg8[%c0_48, %c0_49, %c0_50] : memref<2x8x32xf32, #tpu.memory_space<vmem>>, vector<1x8x32xf32>
    %327 = vector.shape_cast %326 : vector<1x8x32xf32> to vector<8x32xf32>
    %328 = vector.shape_cast %282 : vector<8x32xf32> to vector<1x8x32xf32>
    tpu.vector_store %arg8[%c0_48, %c0_49, %c0_50], %328 {strides = array<i32>} : memref<2x8x32xf32, #tpu.memory_space<vmem>>, vector<1x8x32xf32>,
    %c1_51 = arith.constant 1 : index
    %c0_52 = arith.constant 0 : index
    %c0_53 = arith.constant 0 : index
    %329 = vector.load %arg7[%c1_51, %c0_52, %c0_53] : memref<2x8x32xf32, #tpu.memory_space<vmem>>, vector<1x8x32xf32>
    %330 = vector.shape_cast %329 : vector<1x8x32xf32> to vector<8x32xf32>
    %331 = vector.shape_cast %320 : vector<8x32xf32> to vector<1x8x32xf32>
    tpu.vector_store %arg7[%c1_51, %c0_52, %c0_53], %331 {strides = array<i32>} : memref<2x8x32xf32, #tpu.memory_space<vmem>>, vector<1x8x32xf32>,
    %c1_54 = arith.constant 1 : index
    %c0_55 = arith.constant 0 : index
    %c0_56 = arith.constant 0 : index
    %332 = vector.load %arg8[%c1_54, %c0_55, %c0_56] : memref<2x8x32xf32, #tpu.memory_space<vmem>>, vector<1x8x32xf32>
    %333 = vector.shape_cast %332 : vector<1x8x32xf32> to vector<8x32xf32>
    %334 = vector.shape_cast %318 : vector<8x32xf32> to vector<1x8x32xf32>
    tpu.vector_store %arg8[%c1_54, %c0_55, %c0_56], %334 {strides = array<i32>} : memref<2x8x32xf32, #tpu.memory_space<vmem>>, vector<1x8x32xf32>,
    return
  }
}

</mosaic_0001>

<bundles_post_ra>
// kernel: tpu_custom_call.1
= control target key start
LH: loop header
LB: loop body
LE: loop exit
PB: predicated region body
PF: predicated region fallthrough
CT: control target
= control target key end

     0   :  { %14 = vsyncpa [#allocation3], 0  ;;  %s2245_s0 = inlined_call_operand.vmem [shape: f32[64,8], index: 0, kind: input, shape index: {}]   ;;  %s2246_s1 = inlined_call_operand.vmem [shape: f32[2,8,32], index: 1, kind: input, shape index: {}]   ;;  %s2247_s2 = inlined_call_operand.vmem [shape: f32[2,8,32], index: 2, kind: input, shape index: {}]   ;;  %s2248_s3 = inlined_call_operand.vmem [shape: f32[8,128], index: 3, kind: input, shape index: {}]   ;;  %s2249_s4 = inlined_call_operand.hbm [shape: f32[64,256], index: 4, kind: input, shape index: {}]   ;;  %s2250_s5 = inlined_call_operand.vmem [shape: f32[1,256], index: 5, kind: input, shape index: {}]   ;;  %s2251_s6 = inlined_call_operand.hbm [shape: f32[8,256], index: 6, kind: output, shape index: {0}]   ;;  %s2252_s7 = inlined_call_operand.hbm [shape: f32[2,8,32], index: 7, kind: output, shape index: {1}]   ;;  %s2253_s8 = inlined_call_operand.hbm [shape: f32[2,8,32], index: 8, kind: output, shape index: {2}]  }
   0x1   :  { %15 = vsyncpa [#allocation4], 0 }
   0x2   :  { %16 = vsyncpa [#allocation7], 0  ;;  %s1723_s27 = smov [#allocation2]  }
   0x3   :  { %s30_s28 = sshll.u32 %s1723_s27, 4  ;;  %s31_s28 = int_to_ptr.vmem [resolvable:$true] %s30_s28 }
   0x4   :  { %s1645_s29 = scalar_lea.vmem %s31_s28, 2048  ;;  %p1650_p1 = scmp.lt.s32.totalorder %s31_s28, %s31_s28 }
   0x5   :  { %p1646_p0 = scmp.ne.s32.totalorder %s31_s28, %s1645_s29  ;;  %p1651_p2 = scmp.lt.s32.totalorder %s1645_s29, %s1645_s29 }
   0x7   :  { %p1652_p3 = por %p1651_p2, %p1650_p1 }
   0x9   :  { %p1653_p4 = pnand %p1652_p3, %p1646_p0 }
   0xb   :  { %1656 = shalt.err (!%p1653_p4)
}
   0xc   :  { %s1724_s30 = smov 256   ;;  %s1725_s9 = smov 16  }
   0xd   :  { %36 = dma.hbm_to_vmem [thread:$0]  %s2249_s4, 2048, %s31_s28, [#allocation3], %s1724_s30, %s1724_s30, %s1725_s9  }
   0xe   :  { %1717 = dma.done.wait [#allocation3], 2048  }
   0xf   :  { %1718 = vsyncadd [#allocation3], 4294965248  ;;  %v1726_v0 = vmov 0.0   ;;  %v1447_v1 = vld [vmem:[%s2246_s1 + $0x8] sm:$0xff]  ;;  %v1787_v2 = vld [vmem:[#allocation2 + $0x78] sm:$0xff]  ;;  %s1727_s14 = smov 32   ;;  %v211_v25 = vlaneseq }
  0x10   :  { %289 = vmatprep.mubr.f32.mxu1 %v1726_v0  ;;  %v1789_v3 = vld [vmem:[#allocation2 + $0x70] sm:$0xff]  ;;  %205 = vrot.lane.b32.xlu0 %v1447_v1, %s1727_s14  ;;  %v1793_v4 = vld [vmem:[#allocation2 + $0x68] sm:$0xff]  ;;  %v1795_v5 = vld [vmem:[#allocation2 + $0x60] sm:$0xff]  ;;  %vm51_vm0 = vcmask 64512   ;;  %vm208_vm1 = vcmask 261120   ;;  %vm221_vm2 = vcmask 523264  }
  0x11   :  { %241 = vmatprep.subr.mxu1 %v1787_v2  ;;  %v1798_v6 = vld [vmem:[#allocation2 + $0x58] sm:$0xff]  ;;  %v1801_v7 = vld [vmem:[#allocation2 + $0x50] sm:$0xff]  ;;  %v1804_v8 = vld [vmem:[#allocation2 + $0x48] sm:$0xff]  ;;  %v1894_v26 = vshrl.u32 %v211_v25, 7  ;;  %s1728_s24 = smov 64   ;;  %vm1368_vm3 = vcmask 785408  }
  0x12   :  { %242 = vmatpush1.msra.mxu1 %v1789_v3  ;;  %v50_v9 = vld [vmem:[%s2248_s3] sm:$0xff]  ;;  %v1816_v12 = vld [vmem:[#allocation2 + $0x38] sm:$0xff]  ;;  %v43_v13 = vld [vmem:[%s2245_s0 + $0x8] sm:$0xff]  ;;  %s1730_s15 = smov [#allocation5]  }
  0x13   :  { %243 = vmatprep.subr.mxu1 %v1793_v4  ;;  %v1810_v10 = vld [vmem:[#allocation2 + $0x40] sm:$0xff]  ;;  %1483 = vmatprep.subr.mxu0 %v50_v9  ;;  %v1822_v14 = vld [vmem:[#allocation2 + $0x30] sm:$0xff]  ;;  %v1829_v16 = vld [vmem:[#allocation2 + $0x28] sm:$0xff]  ;;  %v213_v27 = vsub.s32 0, %v1894_v26  ;;  %v217_v63 = vsub.s32 1, %v1894_v26  ;;  %s1399_s16 = sshll.u32 %s1730_s15, 4  ;;  %s1400_s16 = int_to_ptr.vmem [resolvable:$true] %s1399_s16 }
  0x14   :  { %244 = vmatpush1.msra.mxu1 %v1795_v5  ;;  %v42_v11 = vld [vmem:[%s2245_s0] sm:$0xff]  ;;  %1484 = vmatpush3.msra.mxu0 %v50_v9  ;;  %v1837_v18 = vld [vmem:[#allocation2 + $0x18] sm:$0xff]  ;;  %v1841_v19 = vld [vmem:[#allocation2 + $0x10] sm:$0xff]  ;;  %s1657_s17 = scalar_lea.vmem %s1400_s16, 256  ;;  %p1662_p6 = scmp.lt.s32.totalorder %s1400_s16, %s1400_s16 }
  0x15   :  { %245 = vmatprep.subr.mxu1 %v1798_v6  ;;  %1485 = vmatprep.mubr.msk.f32.mxu0 %vm51_vm0, %v42_v11  ;;  %v201_v15 = vld [vmem:[%s2247_s2] sm:$0xff]  ;;  %v1845_v20 = vld [vmem:[#allocation2 + $0x8] sm:$0xff]  ;;  %v44_v47 = vld [vmem:[%s2245_s0 + $0x10] sm:$0xff]  ;;  %p1658_p5 = scmp.ne.s32.totalorder %s1400_s16, %s1657_s17  ;;  %p1663_p7 = scmp.lt.s32.totalorder %s1657_s17, %s1657_s17 }
  0x16   :  { %246 = vmatpush1.msra.mxu1 %v1801_v7  ;;  %1486 = vmatmul.mubr.msk.f32.vlgmr.msra.gmra.mxu0 %vm51_vm0, %v43_v13  ;;  %v1833_v17 = vld [vmem:[#allocation2 + $0x20] sm:$0xff]  ;;  %v45_v48 = vld [vmem:[%s2245_s0 + $0x18] sm:$0xff]  ;;  %v47_v50 = vld [vmem:[%s2245_s0 + $0x28] sm:$0xff] }
  0x17   :  { %247 = vmatprep.subr.mxu1 %v1804_v8  ;;  %304 = vrot.lane.b32.xlu1 %v201_v15, %s1727_s14  ;;  %v1849_v21 = vld [vmem:[#allocation2] sm:$0xff]  ;;  %v48_v51 = vld [vmem:[%s2245_s0 + $0x30] sm:$0xff]  ;;  %v49_v52 = vld [vmem:[%s2245_s0 + $0x38] sm:$0xff]  ;;  %p1664_p8 = por %p1663_p7, %p1662_p6 }
  0x18   :  { %248 = vmatpush1.msra.mxu1 %v1810_v10  ;;  %348 = vmatprep.subr.mxu0 %v1787_v2  ;;  %v198_v22 = vld [vmem:[%s2246_s1] sm:$0xff]  ;;  %v1448_v26 = vld [vmem:[%s2247_s2 + $0x8] sm:$0xff]  ;;  %s1729_s2 = smov 96  }
  0x19   :  { %249 = vmatprep.subr.mxu1 %v1816_v12  ;;  %349 = vmatpush1.msra.mxu0 %v1789_v3  ;;  %v1900_v28 = vld [vmem:[%s2250_s5] sm:$0x3]  ;;  %p1665_p9 = pnand %p1664_p8, %p1658_p5 }
  0x1a   :  { %250 = vmatpush1.msra.mxu1 %v1822_v14  ;;  %350 = vmatprep.subr.mxu0 %v1793_v4  ;;  %v1903_v29 = vrot.slane %v1900_v28, %v213_v27  ;;  %v46_v49 = vld [vmem:[%s2245_s0 + $0x20] sm:$0xff]  ;;  %v1974_v9 = vrot.slane %v1900_v28, %v217_v63 }
  0x1b   :  { %251 = vmatprep.subr.mxu1 %v1829_v16  ;;  %351 = vmatpush1.msra.mxu0 %v1795_v5 }
  0x1c   :  { %252 = vmatpush1.msra.mxu1 %v1833_v17  ;;  %352 = vmatprep.subr.mxu0 %v1798_v6 }
  0x1d   :  { %253 = vmatprep.subr.mxu1 %v1837_v18  ;;  %353 = vmatpush1.msra.mxu0 %v1801_v7 }
  0x1e   :  { %254 = vmatpush1.msra.mxu1 %v1841_v19  ;;  %354 = vmatprep.subr.mxu0 %v1804_v8 }
  0x1f   :  { %255 = vmatprep.subr.mxu1 %v1845_v20  ;;  %355 = vmatpush1.msra.mxu0 %v1810_v10 }
  0x20   :  { %256 = vmatpush1.msra.mxu1 %v1849_v21  ;;  %356 = vmatprep.subr.mxu0 %v1816_v12 }
  0x21   :  { %484 = vmatprep.subr.mxu1 %v1787_v2  ;;  %357 = vmatpush1.msra.mxu0 %v1822_v14 }
  0x22   :  { %358 = vmatprep.subr.mxu0 %v1829_v16  ;;  %1488 = vmatprep.mubr.msk.f32.mxu0 %vm51_vm0, %v44_v47 }
  0x23   :  { %359 = vmatpush1.msra.mxu0 %v1833_v17 }
  0x24   :  { %360 = vmatprep.subr.mxu0 %v1837_v18  ;;  %1489 = vmatmul.mubr.msk.f32.gmra.mxu0 %vm51_vm0, %v45_v48 }
  0x25   :  { %361 = vmatpush1.msra.mxu0 %v1841_v19  ;;  %1491 = vmatprep.mubr.msk.f32.mxu0 %vm51_vm0, %v46_v49 }
  0x26   :  { %362 = vmatprep.subr.mxu0 %v1845_v20 }
  0x27   :  { %363 = vmatpush1.msra.mxu0 %v1849_v21 }
  0x28   :  { %616 = vmatprep.subr.mxu0 %v1787_v2  ;;  %1492 = vmatmul.mubr.msk.f32.gmra.mxu0 %vm51_vm0, %v47_v50 }
  0x29   :  { %1494 = vmatprep.mubr.msk.f32.mxu0 %vm51_vm0, %v48_v51 }
  0x2c   :  { %1495 = vmatmul.mubr.msk.f32.gmra.mxu0 %vm51_vm0, %v49_v52 }
  0x2d   :  { %396 = vmatprep.mubr.f32.mxu0 %v1726_v0 }
  0x82   :  { %v1872_v23 = vpop.permute.xlu0 %205 }
  0x83   :  { %v209_v24 = vsel %vm208_vm1, %v198_v22, %v1872_v23 }
  0x84   :  { %1449 = vmatmul.mubr.msk.f32.vlgmr.msra.gmra.mxu1 %vm221_vm2, %v209_v24 }
  0x85   :  { %485 = vmatpush1.msra.mxu1 %v1789_v3  ;;  %532 = vmatprep.mubr.f32.mxu1 %v1726_v0 }
  0x86   :  { %486 = vmatprep.subr.mxu1 %v1793_v4 }
  0x87   :  { %487 = vmatpush1.msra.mxu1 %v1795_v5 }
  0x88   :  { %488 = vmatprep.subr.mxu1 %v1798_v6 }
  0x89   :  { %489 = vmatpush1.msra.mxu1 %v1801_v7  ;;  %v305_v43 = vpop.permute.xlu1 %304 }
  0x8a   :  { %490 = vmatprep.subr.mxu1 %v1804_v8 }
  0x8b   :  { %491 = vmatpush1.msra.mxu1 %v1810_v10 }
  0x8c   :  { %492 = vmatprep.subr.mxu1 %v1816_v12 }
  0x8d   :  { %493 = vmatpush1.msra.mxu1 %v1822_v14 }
  0x8e   :  { %494 = vmatprep.subr.mxu1 %v1829_v16 }
  0x8f   :  { %495 = vmatpush1.msra.mxu1 %v1833_v17 }
  0x90   :  { %496 = vmatprep.subr.mxu1 %v1837_v18 }
  0x91   :  { %497 = vmatpush1.msra.mxu1 %v1841_v19 }
  0x92   :  { %498 = vmatprep.subr.mxu1 %v1845_v20 }
  0x93   :  { %499 = vmatpush1.msra.mxu1 %v1849_v21 }
  0x94   :  { %748 = vmatprep.subr.mxu1 %v1787_v2 }
  0xd6   :  { %v1905_v30 = vpop.f32.mrf.mxu0 }
  0xd8   :  { %v142_v33 = vpop.f32.mrf.mxu0 }
  0xe4   :  { %v1960_v58 = vpop.f32.mrf.mxu0 }
  0xe6   :  { %v1962_v59 = vpop.f32.mrf.mxu0 }
  0xe8   :  { %v1964_v60 = vpop.f32.mrf.mxu0 }
  0xea   :  { %v1966_v61 = vpop.f32.mrf.mxu0 }
  0xec   :  { %v1968_v62 = vpop.f32.mrf.mxu0 }
  0xee   :  { %v1971_v1 = vpop.f32.mrf.mxu0 }
 0x144   :  { %v291_v31 = vpop.f32.mrf.mxu1 }
 0x145   :  { %v292_v32 = vadd.f32 %v291_v31, %v1903_v29 }
 0x146   :  { %v293_v34 = vpop.f32.mrf.mxu1 }
 0x147   :  { %v295_v35 = vadd.f32 %v292_v32, %v142_v33 }
 0x149   :  { %1509 = vtanh.f32 %v295_v35  ;;  %v1450_v37 = vmul.f32 -1.442695, %v295_v35 }
 0x14b   :  { %1511 = vpow2.f32 %v1450_v37 }
 0x156   :  { %v1510_v36 = vpop.eup %1509 }
 0x157   :  { %309 = vrot.lane.b32.xlu0 %v1510_v36, %s1728_s24 }
 0x158   :  { %v1512_v38 = vpop.eup %1511 }
 0x159   :  { %v299_v39 = vadd.f32 1.0, %v1512_v38 }
 0x15b   :  { %1513 = vrcp.f32 %v299_v39 }
 0x168   :  { %v1514_v40 = vpop.eup %1513 }
 0x169   :  { %v307_v44 = vmul.f32 %v1514_v40, %v305_v43 }
 0x1c9   :  { %v310_v41 = vpop.permute.xlu0 %309 }
 0x1ca   :  { %v312_v42 = vmul.f32 %v1514_v40, %v310_v41 }
 0x1cc   :  { %314 = vrot.lane.b32.xlu1 %v312_v42, %s1727_s14 }
 0x23e   :  { %v315_v45 = vpop.permute.xlu1 %314 }
 0x23f   :  { %v1910_v46 = vadd.f32 %v315_v45, %v307_v44 }
 0x241   :  { %1515 = vtanh.f32 %v1910_v46 }
 0x24e   :  { %v1516_v53 = vpop.eup %1515 }
 0x24f   :  { %320 = vrot.lane.b32.xlu0 %v1516_v53, %s1728_s24 }
 0x2c1   :  { %v321_v54 = vpop.permute.xlu0 %320 }
 0x2c2   :  { %v323_v55 = vmul.f32 %v1514_v40, %v321_v54 }
 0x2c4   :  { %325 = vrot.lane.b32.xlu1 %v323_v55, %s1727_s14 }
 0x336   :  { %v326_v56 = vpop.permute.xlu1 %325 }
 0x337   :  { %v328_v57 = vsel %vm208_vm1, %v326_v56, %v1872_v23 }
 0x338   :  { %1451 = vmatmul.mubr.msk.f32.vlgmr.msra.gmra.mxu0 %vm221_vm2, %v328_v57 }
 0x339   :  { %617 = vmatpush1.msra.mxu0 %v1789_v3  ;;  %664 = vmatprep.mubr.f32.mxu0 %v1726_v0 }
 0x33a   :  { %618 = vmatprep.subr.mxu0 %v1793_v4 }
 0x33b   :  { %619 = vmatpush1.msra.mxu0 %v1795_v5 }
 0x33c   :  { %620 = vmatprep.subr.mxu0 %v1798_v6 }
 0x33d   :  { %621 = vmatpush1.msra.mxu0 %v1801_v7 }
 0x33e   :  { %622 = vmatprep.subr.mxu0 %v1804_v8 }
 0x33f   :  { %623 = vmatpush1.msra.mxu0 %v1810_v10 }
 0x340   :  { %624 = vmatprep.subr.mxu0 %v1816_v12 }
 0x341   :  { %625 = vmatpush1.msra.mxu0 %v1822_v14 }
 0x342   :  { %626 = vmatprep.subr.mxu0 %v1829_v16 }
 0x343   :  { %627 = vmatpush1.msra.mxu0 %v1833_v17 }
 0x344   :  { %628 = vmatprep.subr.mxu0 %v1837_v18 }
 0x345   :  { %629 = vmatpush1.msra.mxu0 %v1841_v19 }
 0x346   :  { %630 = vmatprep.subr.mxu0 %v1845_v20 }
 0x347   :  { %631 = vmatpush1.msra.mxu0 %v1849_v21 }
 0x348   :  { %880 = vmatprep.subr.mxu0 %v1787_v2 }
 0x3f8   :  { %v398_v11 = vpop.f32.mrf.mxu0 }
 0x3f9   :  { %v399_v13 = vadd.f32 %v398_v11, %v1903_v29 }
 0x3fa   :  { %v400_v15 = vpop.f32.mrf.mxu0 }
 0x3fb   :  { %v403_v22 = vadd.f32 %v1905_v30, %v399_v13  ;;  %v401_v23 = vadd.f32 %v400_v15, %v1974_v9 }
 0x3fd   :  { %1517 = vtanh.f32 %v403_v22  ;;  %v1452_v27 = vmul.f32 -1.442695, %v403_v22  ;;  %v1453_v28 = vmul.f32 -1.442695, %v401_v23 }
 0x3fe   :  { %1519 = vtanh.f32 %v401_v23 }
 0x3ff   :  { %1521 = vpow2.f32 %v1452_v27 }
 0x400   :  { %1523 = vpow2.f32 %v1453_v28 }
 0x40a   :  { %v1518_v24 = vpop.eup %1517 }
 0x40b   :  { %v1520_v25 = vpop.eup %1519  ;;  %413 = vrot.lane.b32.xlu0 %v1518_v24, %s1728_s24 }
 0x40c   :  { %441 = vrot.lane.b32.xlu1 %v1520_v25, %s1728_s24  ;;  %v1522_v30 = vpop.eup %1521 }
 0x40d   :  { %v1524_v31 = vpop.eup %1523  ;;  %v407_v32 = vadd.f32 1.0, %v1522_v30 }
 0x40e   :  { %v431_v33 = vadd.f32 1.0, %v1524_v31 }
 0x40f   :  { %436 = vrot.lane.b32.xlu0 %v1448_v26, %s1727_s14  ;;  %1525 = vrcp.f32 %v407_v32 }
 0x410   :  { %1527 = vrcp.f32 %v431_v33 }
 0x41c   :  { %v1526_v34 = vpop.eup %1525 }
 0x41d   :  { %v1528_v36 = vpop.eup %1527  ;;  %v411_v41 = vmul.f32 %v1526_v34, %v1910_v46 }
 0x47d   :  { %v414_v35 = vpop.permute.xlu0 %413 }
 0x47e   :  { %v442_v37 = vpop.permute.xlu1 %441  ;;  %v416_v38 = vmul.f32 %v1526_v34, %v414_v35 }
 0x47f   :  { %v444_v39 = vmul.f32 %v1528_v36, %v442_v37 }
 0x480   :  { %418 = vrot.lane.b32.xlu1 %v416_v38, %s1727_s14 }
 0x481   :  { %446 = vrot.lane.b32.xlu0 %v444_v39, %s1727_s14  ;;  %v437_v40 = vpop.permute.xlu0 %436 }
 0x482   :  { %v439_v42 = vmul.f32 %v1528_v36, %v437_v40 }
 0x4f2   :  { %v419_v43 = vpop.permute.xlu1 %418 }
 0x4f3   :  { %v447_v44 = vpop.permute.xlu0 %446  ;;  %v1988_v45 = vadd.f32 %v419_v43, %v411_v41 }
 0x4f4   :  { %v1990_v47 = vadd.f32 %v447_v44, %v439_v42 }
 0x4f5   :  { %1529 = vtanh.f32 %v1988_v45 }
 0x4f6   :  { %1531 = vtanh.f32 %v1990_v47 }
 0x502   :  { %v1530_v48 = vpop.eup %1529 }
 0x503   :  { %v1532_v49 = vpop.eup %1531  ;;  %424 = vrot.lane.b32.xlu1 %v1530_v48, %s1728_s24 }
 0x504   :  { %452 = vrot.lane.b32.xlu0 %v1532_v49, %s1728_s24 }
 0x575   :  { %v425_v50 = vpop.permute.xlu1 %424 }
 0x576   :  { %v453_v51 = vpop.permute.xlu0 %452  ;;  %v427_v46 = vmul.f32 %v1526_v34, %v425_v50 }
 0x577   :  { %v1996_v52 = vmul.f32 %v1528_v36, %v453_v51 }
 0x578   :  { %457 = vrot.lane.b32.xlu1 %v427_v46, %s1727_s14 }
 0x579   :  { %461 = vrot.lane.b32.xlu0 %v1996_v52, %s1728_s24 }
 0x5ea   :  { %v458_v53 = vpop.permute.xlu1 %457 }
 0x5eb   :  { %v462_v54 = vpop.permute.xlu0 %461 }
 0x5ec   :  { %v464_v55 = vsel %vm208_vm1, %v458_v53, %v462_v54 }
 0x5ed   :  { %1454 = vmatmul.mubr.msk.f32.vlgmr.msra.gmra.mxu1 %vm221_vm2, %v464_v55 }
 0x5ee   :  { %749 = vmatpush1.msra.mxu1 %v1789_v3  ;;  %796 = vmatprep.mubr.f32.mxu1 %v1726_v0 }
 0x5ef   :  { %750 = vmatprep.subr.mxu1 %v1793_v4 }
 0x5f0   :  { %751 = vmatpush1.msra.mxu1 %v1795_v5 }
 0x5f1   :  { %752 = vmatprep.subr.mxu1 %v1798_v6 }
 0x5f2   :  { %753 = vmatpush1.msra.mxu1 %v1801_v7 }
 0x5f3   :  { %754 = vmatprep.subr.mxu1 %v1804_v8 }
 0x5f4   :  { %755 = vmatpush1.msra.mxu1 %v1810_v10 }
 0x5f5   :  { %756 = vmatprep.subr.mxu1 %v1816_v12 }
 0x5f6   :  { %757 = vmatpush1.msra.mxu1 %v1822_v14 }
 0x5f7   :  { %758 = vmatprep.subr.mxu1 %v1829_v16 }
 0x5f8   :  { %759 = vmatpush1.msra.mxu1 %v1833_v17 }
 0x5f9   :  { %760 = vmatprep.subr.mxu1 %v1837_v18 }
 0x5fa   :  { %761 = vmatpush1.msra.mxu1 %v1841_v19 }
 0x5fb   :  { %762 = vmatprep.subr.mxu1 %v1845_v20 }
 0x5fc   :  { %763 = vmatpush1.msra.mxu1 %v1849_v21 }
 0x5fd   :  { %1012 = vmatprep.subr.mxu1 %v1787_v2 }
 0x6ad   :  { %v534_v56 = vpop.f32.mrf.mxu1 }
 0x6ae   :  { %v535_v57 = vadd.f32 %v534_v56, %v1903_v29 }
 0x6af   :  { %v536_v63 = vpop.f32.mrf.mxu1 }
 0x6b0   :  { %v539_v11 = vadd.f32 %v535_v57, %v1962_v59  ;;  %v537_v13 = vadd.f32 %v536_v63, %v1974_v9 }
 0x6b2   :  { %1533 = vtanh.f32 %v539_v11  ;;  %v1455_v23 = vmul.f32 -1.442695, %v539_v11  ;;  %v1456_v24 = vmul.f32 -1.442695, %v537_v13 }
 0x6b3   :  { %1535 = vtanh.f32 %v537_v13 }
 0x6b4   :  { %1537 = vpow2.f32 %v1455_v23 }
 0x6b5   :  { %1539 = vpow2.f32 %v1456_v24 }
 0x6bf   :  { %v1534_v15 = vpop.eup %1533 }
 0x6c0   :  { %v1536_v22 = vpop.eup %1535  ;;  %549 = vrot.lane.b32.xlu1 %v1534_v15, %s1728_s24 }
 0x6c1   :  { %573 = vrot.lane.b32.xlu0 %v1536_v22, %s1728_s24  ;;  %v1538_v25 = vpop.eup %1537 }
 0x6c2   :  { %v1540_v26 = vpop.eup %1539  ;;  %v543_v27 = vadd.f32 1.0, %v1538_v25 }
 0x6c3   :  { %v567_v28 = vadd.f32 1.0, %v1540_v26 }
 0x6c4   :  { %1541 = vrcp.f32 %v543_v27 }
 0x6c5   :  { %1543 = vrcp.f32 %v567_v28 }
 0x6d1   :  { %v1542_v59 = vpop.eup %1541 }
 0x6d2   :  { %v1544_v31 = vpop.eup %1543  ;;  %v547_v35 = vmul.f32 %v1542_v59, %v1988_v45 }
 0x6d3   :  { %v571_v36 = vmul.f32 %v1544_v31, %v1990_v47 }
 0x732   :  { %v550_v30 = vpop.permute.xlu1 %549 }
 0x733   :  { %v574_v32 = vpop.permute.xlu0 %573  ;;  %v552_v33 = vmul.f32 %v1542_v59, %v550_v30 }
 0x734   :  { %v576_v34 = vmul.f32 %v1544_v31, %v574_v32 }
 0x735   :  { %554 = vrot.lane.b32.xlu1 %v552_v33, %s1727_s14 }
 0x736   :  { %578 = vrot.lane.b32.xlu0 %v576_v34, %s1727_s14 }
 0x7a7   :  { %v555_v37 = vpop.permute.xlu1 %554 }
 0x7a8   :  { %v579_v38 = vpop.permute.xlu0 %578  ;;  %v2029_v39 = vadd.f32 %v555_v37, %v547_v35 }
 0x7a9   :  { %v2031_v40 = vadd.f32 %v579_v38, %v571_v36 }
 0x7aa   :  { %1545 = vtanh.f32 %v2029_v39 }
 0x7ab   :  { %1547 = vtanh.f32 %v2031_v40 }
 0x7b7   :  { %v1546_v41 = vpop.eup %1545 }
 0x7b8   :  { %v1548_v42 = vpop.eup %1547  ;;  %560 = vrot.lane.b32.xlu1 %v1546_v41, %s1728_s24 }
 0x7b9   :  { %584 = vrot.lane.b32.xlu0 %v1548_v42, %s1728_s24 }
 0x82a   :  { %v561_v43 = vpop.permute.xlu1 %560 }
 0x82b   :  { %v585_v44 = vpop.permute.xlu0 %584  ;;  %v563_v45 = vmul.f32 %v1542_v59, %v561_v43 }
 0x82c   :  { %v587_v47 = vmul.f32 %v1544_v31, %v585_v44 }
 0x82d   :  { %589 = vrot.lane.b32.xlu1 %v563_v45, %s1727_s14 }
 0x82e   :  { %593 = vrot.lane.b32.xlu0 %v587_v47, %s1728_s24 }
 0x89f   :  { %v590_v48 = vpop.permute.xlu1 %589 }
 0x8a0   :  { %v2039_v49 = vpop.permute.xlu0 %593 }
 0x8a1   :  { %v596_v50 = vsel %vm208_vm1, %v590_v48, %v2039_v49 }
 0x8a2   :  { %1457 = vmatmul.mubr.msk.f32.vlgmr.msra.gmra.mxu0 %vm221_vm2, %v596_v50 }
 0x8a3   :  { %881 = vmatpush1.msra.mxu0 %v1789_v3  ;;  %928 = vmatprep.mubr.f32.mxu0 %v1726_v0 }
 0x8a4   :  { %882 = vmatprep.subr.mxu0 %v1793_v4 }
 0x8a5   :  { %883 = vmatpush1.msra.mxu0 %v1795_v5 }
 0x8a6   :  { %884 = vmatprep.subr.mxu0 %v1798_v6 }
 0x8a7   :  { %885 = vmatpush1.msra.mxu0 %v1801_v7 }
 0x8a8   :  { %886 = vmatprep.subr.mxu0 %v1804_v8 }
 0x8a9   :  { %887 = vmatpush1.msra.mxu0 %v1810_v10 }
 0x8aa   :  { %888 = vmatprep.subr.mxu0 %v1816_v12 }
 0x8ab   :  { %889 = vmatpush1.msra.mxu0 %v1822_v14 }
 0x8ac   :  { %890 = vmatprep.subr.mxu0 %v1829_v16 }
 0x8ad   :  { %891 = vmatpush1.msra.mxu0 %v1833_v17 }
 0x8ae   :  { %892 = vmatprep.subr.mxu0 %v1837_v18 }
 0x8af   :  { %893 = vmatpush1.msra.mxu0 %v1841_v19 }
 0x8b0   :  { %894 = vmatprep.subr.mxu0 %v1845_v20 }
 0x8b1   :  { %895 = vmatpush1.msra.mxu0 %v1849_v21 }
 0x8b2   :  { %1144 = vmatprep.subr.mxu0 %v1787_v2 }
 0x962   :  { %v666_v51 = vpop.f32.mrf.mxu0 }
 0x963   :  { %v667_v46 = vadd.f32 %v666_v51, %v1903_v29 }
 0x964   :  { %v668_v53 = vpop.f32.mrf.mxu0 }
 0x965   :  { %v671_v54 = vadd.f32 %v1960_v58, %v667_v46  ;;  %v669_v55 = vadd.f32 %v668_v53, %v1974_v9 }
 0x967   :  { %1549 = vtanh.f32 %v671_v54  ;;  %v1458_v63 = vmul.f32 -1.442695, %v671_v54  ;;  %v1459_v11 = vmul.f32 -1.442695, %v669_v55 }
 0x968   :  { %1551 = vtanh.f32 %v669_v55 }
 0x969   :  { %1553 = vpow2.f32 %v1458_v63 }
 0x96a   :  { %1555 = vpow2.f32 %v1459_v11 }
 0x974   :  { %v1550_v56 = vpop.eup %1549 }
 0x975   :  { %v1552_v57 = vpop.eup %1551  ;;  %681 = vrot.lane.b32.xlu1 %v1550_v56, %s1728_s24 }
 0x976   :  { %705 = vrot.lane.b32.xlu0 %v1552_v57, %s1728_s24  ;;  %v1554_v13 = vpop.eup %1553 }
 0x977   :  { %v1556_v15 = vpop.eup %1555  ;;  %v675_v22 = vadd.f32 1.0, %v1554_v13 }
 0x978   :  { %v699_v23 = vadd.f32 1.0, %v1556_v15 }
 0x979   :  { %1557 = vrcp.f32 %v675_v22 }
 0x97a   :  { %1559 = vrcp.f32 %v699_v23 }
 0x986   :  { %v1558_v58 = vpop.eup %1557 }
 0x987   :  { %v1560_v25 = vpop.eup %1559  ;;  %v679_v59 = vmul.f32 %v1558_v58, %v2029_v39 }
 0x988   :  { %v703_v30 = vmul.f32 %v1560_v25, %v2031_v40 }
 0x9e7   :  { %v682_v24 = vpop.permute.xlu1 %681 }
 0x9e8   :  { %v706_v26 = vpop.permute.xlu0 %705  ;;  %v684_v27 = vmul.f32 %v1558_v58, %v682_v24 }
 0x9e9   :  { %v708_v28 = vmul.f32 %v1560_v25, %v706_v26 }
 0x9ea   :  { %686 = vrot.lane.b32.xlu1 %v684_v27, %s1727_s14 }
 0x9eb   :  { %710 = vrot.lane.b32.xlu0 %v708_v28, %s1727_s14 }
 0xa5c   :  { %v687_v31 = vpop.permute.xlu1 %686 }
 0xa5d   :  { %v711_v32 = vpop.permute.xlu0 %710  ;;  %v2070_v33 = vadd.f32 %v687_v31, %v679_v59 }
 0xa5e   :  { %v2072_v34 = vadd.f32 %v711_v32, %v703_v30 }
 0xa5f   :  { %1561 = vtanh.f32 %v2070_v33 }
 0xa60   :  { %1563 = vtanh.f32 %v2072_v34 }
 0xa6c   :  { %v1562_v35 = vpop.eup %1561 }
 0xa6d   :  { %v1564_v36 = vpop.eup %1563  ;;  %692 = vrot.lane.b32.xlu1 %v1562_v35, %s1728_s24 }
 0xa6e   :  { %716 = vrot.lane.b32.xlu0 %v1564_v36, %s1728_s24 }
 0xadf   :  { %v693_v37 = vpop.permute.xlu1 %692 }
 0xae0   :  { %v717_v38 = vpop.permute.xlu0 %716  ;;  %v695_v39 = vmul.f32 %v1558_v58, %v693_v37 }
 0xae1   :  { %v2078_v40 = vmul.f32 %v1560_v25, %v717_v38 }
 0xae2   :  { %721 = vrot.lane.b32.xlu1 %v695_v39, %s1727_s14 }
 0xae3   :  { %725 = vrot.lane.b32.xlu0 %v2078_v40, %s1728_s24 }
 0xb54   :  { %v722_v41 = vpop.permute.xlu1 %721 }
 0xb55   :  { %v726_v42 = vpop.permute.xlu0 %725 }
 0xb56   :  { %v728_v43 = vsel %vm208_vm1, %v722_v41, %v726_v42 }
 0xb57   :  { %1460 = vmatmul.mubr.msk.f32.vlgmr.msra.gmra.mxu1 %vm221_vm2, %v728_v43 }
 0xb58   :  { %1013 = vmatpush1.msra.mxu1 %v1789_v3  ;;  %1060 = vmatprep.mubr.f32.mxu1 %v1726_v0 }
 0xb59   :  { %1014 = vmatprep.subr.mxu1 %v1793_v4 }
 0xb5a   :  { %1015 = vmatpush1.msra.mxu1 %v1795_v5 }
 0xb5b   :  { %1016 = vmatprep.subr.mxu1 %v1798_v6 }
 0xb5c   :  { %1017 = vmatpush1.msra.mxu1 %v1801_v7 }
 0xb5d   :  { %1018 = vmatprep.subr.mxu1 %v1804_v8 }
 0xb5e   :  { %1019 = vmatpush1.msra.mxu1 %v1810_v10 }
 0xb5f   :  { %1020 = vmatprep.subr.mxu1 %v1816_v12 }
 0xb60   :  { %1021 = vmatpush1.msra.mxu1 %v1822_v14 }
 0xb61   :  { %1022 = vmatprep.subr.mxu1 %v1829_v16 }
 0xb62   :  { %1023 = vmatpush1.msra.mxu1 %v1833_v17 }
 0xb63   :  { %1024 = vmatprep.subr.mxu1 %v1837_v18 }
 0xb64   :  { %1025 = vmatpush1.msra.mxu1 %v1841_v19 }
 0xb65   :  { %1026 = vmatprep.subr.mxu1 %v1845_v20 }
 0xb66   :  { %1027 = vmatpush1.msra.mxu1 %v1849_v21 }
 0xb67   :  { %1276 = vmatprep.subr.mxu1 %v1787_v2 }
 0xc17   :  { %v798_v44 = vpop.f32.mrf.mxu1 }
 0xc18   :  { %v799_v45 = vadd.f32 %v798_v44, %v1903_v29 }
 0xc19   :  { %v800_v47 = vpop.f32.mrf.mxu1 }
 0xc1a   :  { %v803_v48 = vadd.f32 %v799_v45, %v1966_v61  ;;  %v801_v50 = vadd.f32 %v800_v47, %v1974_v9 }
 0xc1c   :  { %1565 = vtanh.f32 %v803_v48  ;;  %v1461_v53 = vmul.f32 -1.442695, %v803_v48  ;;  %v1462_v54 = vmul.f32 -1.442695, %v801_v50 }
 0xc1d   :  { %1567 = vtanh.f32 %v801_v50 }
 0xc1e   :  { %1569 = vpow2.f32 %v1461_v53 }
 0xc1f   :  { %1571 = vpow2.f32 %v1462_v54 }
 0xc29   :  { %v1566_v51 = vpop.eup %1565 }
 0xc2a   :  { %v1568_v46 = vpop.eup %1567  ;;  %813 = vrot.lane.b32.xlu1 %v1566_v51, %s1728_s24 }
 0xc2b   :  { %837 = vrot.lane.b32.xlu0 %v1568_v46, %s1728_s24  ;;  %v1570_v2 = vpop.eup %1569 }
 0xc2c   :  { %v1572_v55 = vpop.eup %1571  ;;  %v807_v56 = vadd.f32 1.0, %v1570_v2 }
 0xc2d   :  { %v831_v57 = vadd.f32 1.0, %v1572_v55 }
 0xc2e   :  { %1573 = vrcp.f32 %v807_v56 }
 0xc2f   :  { %1575 = vrcp.f32 %v831_v57 }
 0xc3b   :  { %v1574_v61 = vpop.eup %1573 }
 0xc3c   :  { %v1576_v11 = vpop.eup %1575  ;;  %v811_v23 = vmul.f32 %v1574_v61, %v2070_v33 }
 0xc3d   :  { %v835_v58 = vmul.f32 %v1576_v11, %v2072_v34 }
 0xc9c   :  { %v814_v63 = vpop.permute.xlu1 %813 }
 0xc9d   :  { %v838_v13 = vpop.permute.xlu0 %837  ;;  %v816_v15 = vmul.f32 %v1574_v61, %v814_v63 }
 0xc9e   :  { %v840_v22 = vmul.f32 %v1576_v11, %v838_v13 }
 0xc9f   :  { %818 = vrot.lane.b32.xlu1 %v816_v15, %s1727_s14 }
 0xca0   :  { %842 = vrot.lane.b32.xlu0 %v840_v22, %s1727_s14 }
 0xd11   :  { %v819_v24 = vpop.permute.xlu1 %818 }
 0xd12   :  { %v843_v25 = vpop.permute.xlu0 %842  ;;  %v2111_v26 = vadd.f32 %v819_v24, %v811_v23 }
 0xd13   :  { %v2113_v27 = vadd.f32 %v843_v25, %v835_v58 }
 0xd14   :  { %1577 = vtanh.f32 %v2111_v26 }
 0xd15   :  { %1579 = vtanh.f32 %v2113_v27 }
 0xd21   :  { %v1578_v28 = vpop.eup %1577 }
 0xd22   :  { %v1580_v59 = vpop.eup %1579  ;;  %824 = vrot.lane.b32.xlu1 %v1578_v28, %s1728_s24 }
 0xd23   :  { %848 = vrot.lane.b32.xlu0 %v1580_v59, %s1728_s24 }
 0xd94   :  { %v825_v30 = vpop.permute.xlu1 %824 }
 0xd95   :  { %v849_v31 = vpop.permute.xlu0 %848  ;;  %v827_v32 = vmul.f32 %v1574_v61, %v825_v30 }
 0xd96   :  { %v2119_v33 = vmul.f32 %v1576_v11, %v849_v31 }
 0xd97   :  { %853 = vrot.lane.b32.xlu1 %v827_v32, %s1727_s14 }
 0xd98   :  { %857 = vrot.lane.b32.xlu0 %v2119_v33, %s1728_s24 }
 0xe09   :  { %v854_v34 = vpop.permute.xlu1 %853 }
 0xe0a   :  { %v858_v35 = vpop.permute.xlu0 %857 }
 0xe0b   :  { %v860_v36 = vsel %vm208_vm1, %v854_v34, %v858_v35 }
 0xe0c   :  { %1463 = vmatmul.mubr.msk.f32.vlgmr.msra.gmra.mxu0 %vm221_vm2, %v860_v36 }
 0xe0d   :  { %1145 = vmatpush1.msra.mxu0 %v1789_v3  ;;  %1192 = vmatprep.mubr.f32.mxu0 %v1726_v0 }
 0xe0e   :  { %1146 = vmatprep.subr.mxu0 %v1793_v4 }
 0xe0f   :  { %1147 = vmatpush1.msra.mxu0 %v1795_v5 }
 0xe10   :  { %1148 = vmatprep.subr.mxu0 %v1798_v6 }
 0xe11   :  { %1149 = vmatpush1.msra.mxu0 %v1801_v7 }
 0xe12   :  { %1150 = vmatprep.subr.mxu0 %v1804_v8 }
 0xe13   :  { %1151 = vmatpush1.msra.mxu0 %v1810_v10 }
 0xe14   :  { %1152 = vmatprep.subr.mxu0 %v1816_v12 }
 0xe15   :  { %1153 = vmatpush1.msra.mxu0 %v1822_v14 }
 0xe16   :  { %1154 = vmatprep.subr.mxu0 %v1829_v16 }
 0xe17   :  { %1155 = vmatpush1.msra.mxu0 %v1833_v17 }
 0xe18   :  { %1156 = vmatprep.subr.mxu0 %v1837_v18 }
 0xe19   :  { %1157 = vmatpush1.msra.mxu0 %v1841_v19 }
 0xe1a   :  { %1158 = vmatprep.subr.mxu0 %v1845_v20 }
 0xe1b   :  { %1159 = vmatpush1.msra.mxu0 %v1849_v21 }
 0xecc   :  { %v930_v37 = vpop.f32.mrf.mxu0 }
 0xecd   :  { %v931_v38 = vadd.f32 %v930_v37, %v1903_v29 }
 0xece   :  { %v932_v39 = vpop.f32.mrf.mxu0 }
 0xecf   :  { %v935_v41 = vadd.f32 %v1964_v60, %v931_v38  ;;  %v933_v42 = vadd.f32 %v932_v39, %v1974_v9 }
 0xed1   :  { %1581 = vtanh.f32 %v935_v41  ;;  %v1464_v45 = vmul.f32 -1.442695, %v935_v41  ;;  %v1465_v47 = vmul.f32 -1.442695, %v933_v42 }
 0xed2   :  { %1583 = vtanh.f32 %v933_v42 }
 0xed3   :  { %1585 = vpow2.f32 %v1464_v45 }
 0xed4   :  { %1587 = vpow2.f32 %v1465_v47 }
 0xede   :  { %v1582_v43 = vpop.eup %1581 }
 0xedf   :  { %v1584_v44 = vpop.eup %1583  ;;  %945 = vrot.lane.b32.xlu1 %v1582_v43, %s1728_s24 }
 0xee0   :  { %969 = vrot.lane.b32.xlu0 %v1584_v44, %s1728_s24  ;;  %v1586_v48 = vpop.eup %1585 }
 0xee1   :  { %v1588_v50 = vpop.eup %1587  ;;  %v939_v51 = vadd.f32 1.0, %v1586_v48 }
 0xee2   :  { %v963_v46 = vadd.f32 1.0, %v1588_v50 }
 0xee3   :  { %1589 = vrcp.f32 %v939_v51 }
 0xee4   :  { %1591 = vrcp.f32 %v963_v46 }
 0xef0   :  { %v1590_v60 = vpop.eup %1589 }
 0xef1   :  { %v1592_v54 = vpop.eup %1591  ;;  %v943_v57 = vmul.f32 %v1590_v60, %v2111_v26 }
 0xef2   :  { %v967_v61 = vmul.f32 %v1592_v54, %v2113_v27 }
 0xf51   :  { %v946_v53 = vpop.permute.xlu1 %945 }
 0xf52   :  { %v970_v2 = vpop.permute.xlu0 %969  ;;  %v948_v55 = vmul.f32 %v1590_v60, %v946_v53 }
 0xf53   :  { %v972_v56 = vmul.f32 %v1592_v54, %v970_v2 }
 0xf54   :  { %950 = vrot.lane.b32.xlu1 %v948_v55, %s1727_s14 }
 0xf55   :  { %974 = vrot.lane.b32.xlu0 %v972_v56, %s1727_s14 }
 0xfc6   :  { %v951_v63 = vpop.permute.xlu1 %950 }
 0xfc7   :  { %v975_v11 = vpop.permute.xlu0 %974  ;;  %v2151_v13 = vadd.f32 %v951_v63, %v943_v57 }
 0xfc8   :  { %v2153_v15 = vadd.f32 %v975_v11, %v967_v61 }
 0xfc9   :  { %1593 = vtanh.f32 %v2151_v13 }
 0xfca   :  { %1595 = vtanh.f32 %v2153_v15 }
 0xfd6   :  { %v1594_v22 = vpop.eup %1593 }
 0xfd7   :  { %v1596_v23 = vpop.eup %1595  ;;  %956 = vrot.lane.b32.xlu1 %v1594_v22, %s1728_s24 }
 0xfd8   :  { %980 = vrot.lane.b32.xlu0 %v1596_v23, %s1728_s24 }
0x1049   :  { %v957_v58 = vpop.permute.xlu1 %956 }
0x104a   :  { %v981_v24 = vpop.permute.xlu0 %980  ;;  %v959_v25 = vmul.f32 %v1590_v60, %v957_v58 }
0x104b   :  { %v2159_v26 = vmul.f32 %v1592_v54, %v981_v24 }
0x104c   :  { %985 = vrot.lane.b32.xlu1 %v959_v25, %s1727_s14 }
0x104d   :  { %989 = vrot.lane.b32.xlu0 %v2159_v26, %s1728_s24 }
0x10be   :  { %v986_v27 = vpop.permute.xlu1 %985 }
0x10bf   :  { %v990_v28 = vpop.permute.xlu0 %989 }
0x10c0   :  { %v992_v59 = vsel %vm208_vm1, %v986_v27, %v990_v28 }
0x10c1   :  { %1466 = vmatmul.mubr.msk.f32.vlgmr.msra.gmra.mxu1 %vm221_vm2, %v992_v59 }
0x10c2   :  { %1277 = vmatpush1.msra.mxu1 %v1789_v3  ;;  %1324 = vmatprep.mubr.f32.mxu1 %v1726_v0 }
0x10c3   :  { %1278 = vmatprep.subr.mxu1 %v1793_v4 }
0x10c4   :  { %1279 = vmatpush1.msra.mxu1 %v1795_v5 }
0x10c5   :  { %1280 = vmatprep.subr.mxu1 %v1798_v6 }
0x10c6   :  { %1281 = vmatpush1.msra.mxu1 %v1801_v7 }
0x10c7   :  { %1282 = vmatprep.subr.mxu1 %v1804_v8 }
0x10c8   :  { %1283 = vmatpush1.msra.mxu1 %v1810_v10 }
0x10c9   :  { %1284 = vmatprep.subr.mxu1 %v1816_v12 }
0x10ca   :  { %1285 = vmatpush1.msra.mxu1 %v1822_v14 }
0x10cb   :  { %1286 = vmatprep.subr.mxu1 %v1829_v16 }
0x10cc   :  { %1287 = vmatpush1.msra.mxu1 %v1833_v17 }
0x10cd   :  { %1288 = vmatprep.subr.mxu1 %v1837_v18 }
0x10ce   :  { %1289 = vmatpush1.msra.mxu1 %v1841_v19 }
0x10cf   :  { %1290 = vmatprep.subr.mxu1 %v1845_v20 }
0x10d0   :  { %1291 = vmatpush1.msra.mxu1 %v1849_v21 }
0x1181   :  { %v1062_v0 = vpop.f32.mrf.mxu1 }
0x1182   :  { %v1063_v3 = vadd.f32 %v1062_v0, %v1903_v29 }
0x1183   :  { %v1064_v4 = vpop.f32.mrf.mxu1 }
0x1184   :  { %v1067_v5 = vadd.f32 %v1063_v3, %v1971_v1  ;;  %v1065_v6 = vadd.f32 %v1064_v4, %v1974_v9 }
0x1186   :  { %1597 = vtanh.f32 %v1067_v5  ;;  %v1467_v10 = vmul.f32 -1.442695, %v1067_v5  ;;  %v1468_v12 = vmul.f32 -1.442695, %v1065_v6 }
0x1187   :  { %1599 = vtanh.f32 %v1065_v6 }
0x1188   :  { %1601 = vpow2.f32 %v1467_v10 }
0x1189   :  { %1603 = vpow2.f32 %v1468_v12 }
0x1193   :  { %v1598_v7 = vpop.eup %1597 }
0x1194   :  { %v1600_v8 = vpop.eup %1599  ;;  %1077 = vrot.lane.b32.xlu1 %v1598_v7, %s1728_s24 }
0x1195   :  { %1101 = vrot.lane.b32.xlu0 %v1600_v8, %s1728_s24  ;;  %v1602_v14 = vpop.eup %1601 }
0x1196   :  { %v1604_v16 = vpop.eup %1603  ;;  %v1071_v17 = vadd.f32 1.0, %v1602_v14 }
0x1197   :  { %v1095_v18 = vadd.f32 1.0, %v1604_v16 }
0x1198   :  { %1605 = vrcp.f32 %v1071_v17 }
0x1199   :  { %1607 = vrcp.f32 %v1095_v18 }
0x11a5   :  { %v1606_v19 = vpop.eup %1605 }
0x11a6   :  { %v1608_v21 = vpop.eup %1607  ;;  %v1075_v32 = vmul.f32 %v1606_v19, %v2151_v13 }
0x11a7   :  { %v1099_v34 = vmul.f32 %v1608_v21, %v2153_v15 }
0x1206   :  { %v1078_v20 = vpop.permute.xlu1 %1077 }
0x1207   :  { %v1102_v1 = vpop.permute.xlu0 %1101  ;;  %v1080_v30 = vmul.f32 %v1606_v19, %v1078_v20 }
0x1208   :  { %v1104_v31 = vmul.f32 %v1608_v21, %v1102_v1 }
0x1209   :  { %1082 = vrot.lane.b32.xlu1 %v1080_v30, %s1727_s14 }
0x120a   :  { %1106 = vrot.lane.b32.xlu0 %v1104_v31, %s1727_s14 }
0x127b   :  { %v1083_v35 = vpop.permute.xlu1 %1082 }
0x127c   :  { %v1107_v36 = vpop.permute.xlu0 %1106  ;;  %v1085_v37 = vadd.f32 %v1083_v35, %v1075_v32 }
0x127d   :  { %v1109_v38 = vadd.f32 %v1107_v36, %v1099_v34 }
0x127e   :  { %1609 = vtanh.f32 %v1085_v37 }
0x127f   :  { %1611 = vtanh.f32 %v1109_v38 }
0x128b   :  { %v1610_v39 = vpop.eup %1609 }
0x128c   :  { %v1612_v41 = vpop.eup %1611  ;;  %1088 = vrot.lane.b32.xlu1 %v1610_v39, %s1728_s24 }
0x128d   :  { %1112 = vrot.lane.b32.xlu0 %v1612_v41, %s1728_s24 }
0x12fe   :  { %v1089_v42 = vpop.permute.xlu1 %1088 }
0x12ff   :  { %v1113_v43 = vpop.permute.xlu0 %1112  ;;  %v1091_v44 = vmul.f32 %v1606_v19, %v1089_v42 }
0x1300   :  { %v1115_v45 = vmul.f32 %v1608_v21, %v1113_v43 }
0x1301   :  { %1117 = vrot.lane.b32.xlu1 %v1091_v44, %s1727_s14 }
0x1302   :  { %1121 = vrot.lane.b32.xlu0 %v1115_v45, %s1728_s24 }
0x1373   :  { %v1118_v47 = vpop.permute.xlu1 %1117 }
0x1374   :  { %v2195_v48 = vpop.permute.xlu0 %1121 }
0x1375   :  { %v1124_v50 = vsel %vm208_vm1, %v1118_v47, %v2195_v48 }
0x1376   :  { %1469 = vmatmul.mubr.msk.f32.vlgmr.msra.gmra.mxu0 %vm221_vm2, %v1124_v50 }
0x1436   :  { %v1194_v51 = vpop.f32.mrf.mxu0 }
0x1437   :  { %v1195_v46 = vadd.f32 %v1194_v51, %v1903_v29 }
0x1438   :  { %v1196_v60 = vpop.f32.mrf.mxu0 }
0x1439   :  { %v1199_v53 = vadd.f32 %v1968_v62, %v1195_v46  ;;  %v1197_v54 = vadd.f32 %v1196_v60, %v1974_v9 }
0x143b   :  { %1613 = vtanh.f32 %v1199_v53  ;;  %v1470_v56 = vmul.f32 -1.442695, %v1199_v53  ;;  %v1471_v57 = vmul.f32 -1.442695, %v1197_v54 }
0x143c   :  { %1615 = vtanh.f32 %v1197_v54 }
0x143d   :  { %1617 = vpow2.f32 %v1470_v56 }
0x143e   :  { %1619 = vpow2.f32 %v1471_v57 }
0x1448   :  { %v1614_v2 = vpop.eup %1613 }
0x1449   :  { %v1616_v55 = vpop.eup %1615  ;;  %1209 = vrot.lane.b32.xlu1 %v1614_v2, %s1728_s24 }
0x144a   :  { %1233 = vrot.lane.b32.xlu0 %v1616_v55, %s1728_s24  ;;  %v1618_v61 = vpop.eup %1617 }
0x144b   :  { %v1620_v63 = vpop.eup %1619  ;;  %v1203_v29 = vadd.f32 1.0, %v1618_v61 }
0x144c   :  { %v1227_v11 = vadd.f32 1.0, %v1620_v63 }
0x144d   :  { %1621 = vrcp.f32 %v1203_v29 }
0x144e   :  { %1623 = vrcp.f32 %v1227_v11 }
0x145a   :  { %v1622_v62 = vpop.eup %1621 }
0x145b   :  { %v1624_v15 = vpop.eup %1623  ;;  %v1207_v24 = vmul.f32 %v1622_v62, %v1085_v37 }
0x145c   :  { %v1231_v25 = vmul.f32 %v1624_v15, %v1109_v38 }
0x14bb   :  { %v1210_v13 = vpop.permute.xlu1 %1209 }
0x14bc   :  { %v1234_v22 = vpop.permute.xlu0 %1233  ;;  %v1212_v23 = vmul.f32 %v1622_v62, %v1210_v13 }
0x14bd   :  { %v1236_v58 = vmul.f32 %v1624_v15, %v1234_v22 }
0x14be   :  { %1214 = vrot.lane.b32.xlu1 %v1212_v23, %s1727_s14 }
0x14bf   :  { %1238 = vrot.lane.b32.xlu0 %v1236_v58, %s1727_s14 }
0x1530   :  { %v1215_v27 = vpop.permute.xlu1 %1214 }
0x1531   :  { %v1239_v28 = vpop.permute.xlu0 %1238  ;;  %v1217_v59 = vadd.f32 %v1215_v27, %v1207_v24 }
0x1532   :  { %v1241_v0 = vadd.f32 %v1239_v28, %v1231_v25 }
0x1533   :  { %1625 = vtanh.f32 %v1217_v59 }
0x1534   :  { %1627 = vtanh.f32 %v1241_v0 }
0x1540   :  { %v1626_v3 = vpop.eup %1625 }
0x1541   :  { %v1628_v4 = vpop.eup %1627  ;;  %1220 = vrot.lane.b32.xlu1 %v1626_v3, %s1728_s24 }
0x1542   :  { %1244 = vrot.lane.b32.xlu0 %v1628_v4, %s1728_s24 }
0x15b3   :  { %v1221_v5 = vpop.permute.xlu1 %1220 }
0x15b4   :  { %v1245_v6 = vpop.permute.xlu0 %1244  ;;  %v1223_v7 = vmul.f32 %v1622_v62, %v1221_v5 }
0x15b5   :  { %v1247_v8 = vmul.f32 %v1624_v15, %v1245_v6 }
0x15b6   :  { %1249 = vrot.lane.b32.xlu1 %v1223_v7, %s1727_s14 }
0x15b7   :  { %1253 = vrot.lane.b32.xlu0 %v1247_v8, %s1728_s24 }
0x1628   :  { %v1250_v10 = vpop.permute.xlu1 %1249 }
0x1629   :  { %v1254_v12 = vpop.permute.xlu0 %1253  ;;  %1375 = vst.msk [vmem:[#allocation6] sm:$0xff] %vm208_vm1, %v1250_v10 }
0x162a   :  { %v1256_v14 = vsel %vm208_vm1, %v1250_v10, %v1254_v12 }
0x162b   :  { %1472 = vmatmul.mubr.msk.f32.vlgmr.msra.gmra.mxu1 %vm221_vm2, %v1256_v14 }
0x16eb   :  { %v1326_v16 = vpop.f32.mrf.mxu1 }
0x16ed   :  { %v1327_v17 = vpop.f32.mrf.mxu1 }
0x16ee   :  { %v1328_v18 = vadd.f32 %v1327_v17, %v1974_v9 }
0x16f0   :  { %1629 = vtanh.f32 %v1328_v18  ;;  %v1473_v20 = vmul.f32 -1.442695, %v1328_v18 }
0x16f2   :  { %1631 = vpow2.f32 %v1473_v20 }
0x16fd   :  { %v1630_v19 = vpop.eup %1629 }
0x16fe   :  { %1339 = vrot.lane.b32.xlu1 %v1630_v19, %s1728_s24 }
0x16ff   :  { %v1632_v21 = vpop.eup %1631 }
0x1700   :  { %v1333_v1 = vadd.f32 1.0, %v1632_v21 }
0x1702   :  { %1633 = vrcp.f32 %v1333_v1 }
0x170f   :  { %v1634_v30 = vpop.eup %1633 }
0x1710   :  { %v1337_v9 = vmul.f32 %v1634_v30, %v1241_v0 }
0x1770   :  { %v1340_v31 = vpop.permute.xlu1 %1339 }
0x1771   :  { %v1342_v32 = vmul.f32 %v1634_v30, %v1340_v31 }
0x1773   :  { %1344 = vrot.lane.b32.xlu0 %v1342_v32, %s1727_s14 }
0x1777   :  { %1354 = vrot.lane.b32.xlu0 %v1996_v52, %s1727_s14 }
0x177b   :  { %1357 = vrot.lane.b32.xlu0 %v2078_v40, %s1729_s2 }
0x17e5   :  { %v1345_v34 = vpop.permute.xlu0 %1344 }
0x17e6   :  { %v1347_v35 = vadd.f32 %v1345_v34, %v1337_v9 }
0x17e8   :  { %1635 = vtanh.f32 %v1347_v35 }
0x17e9   :  { %v1355_v36 = vpop.permute.xlu0 %1354 }
0x17ea   :  { %v1366_v37 = vsel %vm208_vm1, %v1355_v36, %v2039_v49 }
0x17ed   :  { %v1358_v38 = vpop.permute.xlu0 %1357 }
0x17ee   :  { %v1367_v39 = vsel %vm221_vm2, %v1366_v37, %v1358_v38 }
0x17ef   :  { %v1369_v41 = vsel %vm1368_vm3, %v1367_v39, %v2119_v33 }
0x17f0   :  { %1373 = vst [vmem:[#allocation5] sm:$0xff] %v1369_v41 }
0x17f5   :  { %v1636_v52 = vpop.eup %1635 }
0x17f6   :  { %1350 = vrot.lane.b32.xlu1 %v1636_v52, %s1728_s24 }
0x17fa   :  { %1360 = vrot.lane.b32.xlu1 %v2159_v26, %s1727_s14 }
0x17fe   :  { %1363 = vrot.lane.b32.xlu1 %v1247_v8, %s1729_s2 }
0x1802   :  { %1377 = vrot.lane.b32.xlu1 %v1217_v59, %s1729_s2 }
0x1868   :  { %v1351_v40 = vpop.permute.xlu1 %1350 }
0x1869   :  { %v1353_v42 = vmul.f32 %v1634_v30, %v1351_v40 }
0x186b   :  { %1382 = vrot.lane.b32.xlu0 %v1353_v42, %s1727_s14 }
0x186c   :  { %v1361_v49 = vpop.permute.xlu1 %1360 }
0x186d   :  { %v1370_v33 = vsel %vm208_vm1, %v1361_v49, %v2195_v48 }
0x186f   :  { %1388 = vrot.lane.b32.xlu0 %v1347_v35, %s1729_s2 }
0x1870   :  { %v1364_v43 = vpop.permute.xlu1 %1363 }
0x1871   :  { %v1371_v44 = vsel %vm221_vm2, %v1370_v33, %v1364_v43 }
0x1872   :  { %v1372_v45 = vsel %vm1368_vm3, %v1371_v44, %v1353_v42 }
0x1873   :  { %1374 = vst [vmem:[#allocation5 + $0x8] sm:$0xff] %v1372_v45 }
0x1874   :  { %v1378_v26 = vpop.permute.xlu1 %1377 }
0x1875   :  { %1668 = shalt.err (!%p1665_p9)
}
0x1876   :  { %1402 = dma.vmem_to_hbm [thread:$0]  %s1400_s16, 256, %s2251_s6, [#allocation4]   ;;  %1380 = vst.msk [vmem:[#allocation8] sm:$0xff] %vm208_vm1, %v1378_v26 }
0x1877   :  { %s1731_s19 = smov [#allocation6]   ;;  %s1732_s20 = smov [#allocation8]  }
0x1878   :  { %s1408_s3 = sshll.u32 %s1731_s19, 4  ;;  %s1420_s21 = sshll.u32 %s1732_s20, 4  ;;  %s1409_s3 = int_to_ptr.vmem [resolvable:$true] %s1408_s3  ;;  %s1421_s21 = int_to_ptr.vmem [resolvable:$true] %s1420_s21 }
0x1879   :  { %s1677_s22 = scalar_lea.vmem %s1409_s3, 256  ;;  %p1682_p11 = scmp.lt.s32.totalorder %s1409_s3, %s1409_s3 }
0x187a   :  { %p1678_p10 = scmp.ne.s32.totalorder %s1409_s3, %s1677_s22  ;;  %p1683_p12 = scmp.lt.s32.totalorder %s1677_s22, %s1677_s22 }
0x187c   :  { %p1684_p13 = por %p1683_p12, %p1682_p11 }
0x187e   :  { %p1685_p0 = pnand %p1684_p13, %p1678_p10 }
0x18dd   :  { %v1383_v47 = vpop.permute.xlu0 %1382 }
0x18de   :  { %1386 = vst.msk [vmem:[#allocation6 + $0x8] sm:$0xff] %vm208_vm1, %v1383_v47 }
0x18df   :  { %1688 = shalt.err (!%p1685_p0)
}
0x18e0   :  { %s1733_s1 = smov 128   ;;  %s1734_s23 = smov 8  }
0x18e1   :  { %1414 = dma.vmem_to_hbm [thread:$0]  %s1409_s3, 256, %s2252_s7, [#allocation7], %s1733_s1, %s1733_s1, %s1734_s23   ;;  %v1389_v48 = vpop.permute.xlu0 %1388 }
0x18e2   :  { %1392 = vst.msk [vmem:[#allocation8 + $0x8] sm:$0xff] %vm208_vm1, %v1389_v48  ;;  %s1697_s5 = scalar_lea.vmem %s1421_s21, 256  ;;  %p1702_p2 = scmp.lt.s32.totalorder %s1421_s21, %s1421_s21 }
0x18e3   :  { %p1698_p1 = scmp.ne.s32.totalorder %s1421_s21, %s1697_s5  ;;  %p1703_p3 = scmp.lt.s32.totalorder %s1697_s5, %s1697_s5 }
0x18e5   :  { %p1704_p4 = por %p1703_p3, %p1702_p2 }
0x18e7   :  { %p1705_p5 = pnand %p1704_p4, %p1698_p1 }
0x18e9   :  { %1708 = shalt.err (!%p1705_p5)
}
0x18ea   :  { %1426 = dma.vmem_to_hbm [thread:$0]  %s1421_s21, 256, %s2253_s8, [#allocation7], %s1733_s1, %s1733_s1, %s1734_s23  }
0x18eb   :  { %1719 = dma.done.wait [#allocation4], 256  }
0x18ec   :  { %1720 = vsyncadd [#allocation4], 4294967040 }
0x18ed   :  { %1721 = dma.done.wait [#allocation7], 512  }
0x18ee   :  { %1722 = vsyncadd [#allocation7], 4294966784 }
0x18ef   :  { %1436 = vsyncpa [#allocation3], 1 }
0x18f0   :  { %1437 = vsyncpa [#allocation4], 1 }
0x18f1   :  { %1438 = vsyncpa [#allocation7], 1 }

</bundles_post_ra>
